<compile_context>
chip_gen: v6e
topology: v6e:2x2x1
jax: 0.10.0
libtpu: 0.0.40
codegen_flags: <defaults>
</compile_context>

<pallas_src>
import functools

import jax
import jax.numpy as jnp
from jax.experimental import pallas as pl
from jax.experimental.pallas import tpu as pltpu


_VMEM_LIMIT = 64 * 1024 * 1024   # explicit scoped-VMEM budget


# --------------------------------------------------------------------------
# helpers
# --------------------------------------------------------------------------
def _round_up(x, m):
    return ((x + m - 1) // m) * m


def _pick_tile(dim, target, quantum):
    """Largest tile <= target that is a multiple of `quantum` and divides dim,
    else the full dim."""
    if dim <= target:
        return dim
    t = (target // quantum) * quantum
    while t >= quantum:
        if dim % t == 0:
            return t
        t -= quantum
    return dim


def _pad_gate_cols(w, H, Hp):
    """Pad each of the 4 (i,f,g,o) gate blocks along the last dim from H to Hp."""
    if Hp == H:
        return w
    lead = w.shape[:-1]
    w4 = w.reshape(lead + (4, H))
    pad = [(0, 0)] * len(lead) + [(0, 0), (0, Hp - H)]
    return jnp.pad(w4, pad).reshape(lead + (4 * Hp,))


def _pad_rows(w, H, Hp):
    if Hp == H:
        return w
    return jnp.pad(w, ((0, Hp - H),) + ((0, 0),) * (w.ndim - 1))


# --------------------------------------------------------------------------
# Tiled matmul + bias (used for the hoisted input projections).
# bf16 operands on the MXU, f32 accumulation, bias folded in at the last K step.
# --------------------------------------------------------------------------
def _matmul_bias_kernel(x_ref, w_ref, b_ref, o_ref, acc_ref):
    k = pl.program_id(2)

    @pl.when(k == 0)
    def _():
        acc_ref[...] = jnp.zeros_like(acc_ref)

    acc_ref[...] += jnp.dot(x_ref[...], w_ref[...],
                            preferred_element_type=jnp.float32)

    @pl.when(k == pl.num_programs(2) - 1)
    def _():
        o_ref[...] = (acc_ref[...] + b_ref[...]).astype(o_ref.dtype)


def matmul_bias_pallas(x, w, b, *, tm=256, tn=512, tk=512):
    """x: (M, K) bf16; w: (K, N) bf16; b: (1, N) f32 -> (M, N) f32."""
    M, K = x.shape
    K2, N = w.shape
    assert K == K2
    tm = _pick_tile(M, tm, 8)
    tn = _pick_tile(N, tn, 128)
    tk = _pick_tile(K, tk, 128)
    grid = (M // tm, N // tn, K // tk)
    return pl.pallas_call(
        _matmul_bias_kernel,
        out_shape=jax.ShapeDtypeStruct((M, N), jnp.float32),
        grid_spec=pltpu.PrefetchScalarGridSpec(
            num_scalar_prefetch=0,
            grid=grid,
            in_specs=[
                pl.BlockSpec((tm, tk), lambda i, j, k: (i, k)),
                pl.BlockSpec((tk, tn), lambda i, j, k: (k, j)),
                pl.BlockSpec((1, tn), lambda i, j, k: (0, j)),
            ],
            out_specs=pl.BlockSpec((tm, tn), lambda i, j, k: (i, j)),
            scratch_shapes=[pltpu.VMEM((tm, tn), jnp.float32)],
        ),
        compiler_params=pltpu.CompilerParams(
            dimension_semantics=("parallel", "parallel", "arbitrary"),
            vmem_limit_bytes=_VMEM_LIMIT),
    )(x, w, b)


# --------------------------------------------------------------------------
# Fused bidirectional LSTM recurrence.
# gx: precomputed input gates for both directions (2, T, B, 4Hp); dir 1 is
# already time-reversed.  W_hh (2, Hp, 4Hp) bf16 is copied once into VMEM
# scratch (single-buffered).  Outputs hf/hb are both aligned to player order.
# --------------------------------------------------------------------------
def bilstm_pallas(gx, whh_dir):
    D, P, B, G4 = gx.shape
    Hp = G4 // 4

    def kernel(gx_ref, whh_hbm, hf_ref, hb_ref, h_scr, c_scr, whh_vmem, sem):
        t = pl.program_id(0)

        @pl.when(t == 0)
        def _():
            cp = pltpu.make_async_copy(whh_hbm, whh_vmem, sem)
            cp.start()                         # overlap weight DMA with state init
            h_scr[...] = jnp.zeros_like(h_scr)
            c_scr[...] = jnp.zeros_like(c_scr)
            cp.wait()

        outs = []
        for d in range(2):                      # static unroll over the 2 directions
            gates = gx_ref[d, 0] + jnp.dot(
                h_scr[d].astype(whh_vmem.dtype), whh_vmem[d],
                preferred_element_type=jnp.float32)              # (B, 4Hp)
            if_ = jax.nn.sigmoid(gates[:, 0:2 * Hp])             # i | f, one EUP launch
            g = jnp.tanh(gates[:, 2 * Hp:3 * Hp])
            o = jax.nn.sigmoid(gates[:, 3 * Hp:4 * Hp])
            c = if_[:, Hp:2 * Hp] * c_scr[d] + if_[:, 0:Hp] * g
            h = o * jnp.tanh(c)
            c_scr[d] = c
            h_scr[d] = h
            outs.append(h)
        hf_ref[0] = outs[0]
        hb_ref[0] = outs[1]

    return pl.pallas_call(
        kernel,
        out_shape=(jax.ShapeDtypeStruct((P, B, Hp), jnp.float32),
                   jax.ShapeDtypeStruct((P, B, Hp), jnp.float32)),
        grid_spec=pltpu.PrefetchScalarGridSpec(
            num_scalar_prefetch=0,
            grid=(P,),
            in_specs=[
                pl.BlockSpec((2, 1, B, 4 * Hp), lambda t: (0, t, 0, 0)),
                pl.BlockSpec(memory_space=pl.ANY),       # W_hh stays in HBM; copied once
            ],
            out_specs=(
                pl.BlockSpec((1, B, Hp), lambda t: (t, 0, 0)),
                pl.BlockSpec((1, B, Hp), lambda t: (P - 1 - t, 0, 0)),  # re-align bwd dir
            ),
            scratch_shapes=[
                pltpu.VMEM((2, B, Hp), jnp.float32),     # h carry
                pltpu.VMEM((2, B, Hp), jnp.float32),     # c carry
                pltpu.VMEM((2, Hp, 4 * Hp), whh_dir.dtype),  # resident (single-buffered) W_hh
                pltpu.SemaphoreType.DMA(()),
            ],
        ),
        compiler_params=pltpu.CompilerParams(
            dimension_semantics=("arbitrary",),
            vmem_limit_bytes=_VMEM_LIMIT),
    )(gx, whh_dir)


# --------------------------------------------------------------------------
# Fused early pooling (max of fwd/bwd) + per-group attention softmax scaling.
# Grid over the 2 groups of 6 players.  Dropout(0.5) before the attention
# Linear is identity at inference.
# --------------------------------------------------------------------------
def pool_attn_pallas(h_f, h_b, w_att, b_att, group_size):
    P, B, Hp = h_f.shape
    G = group_size
    n_groups = P // G

    def kernel(hf_ref, hb_ref, watt_ref, batt_ref, out_ref):
        pooled = jnp.maximum(hf_ref[...], hb_ref[...])              # (G, B, Hp)
        w = watt_ref[...].reshape(1, 1, Hp)
        scores = jnp.sum(pooled * w, axis=-1, keepdims=True) + batt_ref[...]   # (G, B, 1)
        m = jnp.max(scores, axis=0, keepdims=True)
        e = jnp.exp(scores - m)
        gamma = e / jnp.sum(e, axis=0, keepdims=True)               # softmax over players
        out_ref[0] = pooled * gamma

    return pl.pallas_call(
        kernel,
        out_shape=jax.ShapeDtypeStruct((n_groups, G, B, Hp), jnp.float32),
        grid_spec=pltpu.PrefetchScalarGridSpec(
            num_scalar_prefetch=0,
            grid=(n_groups,),
            in_specs=[
                pl.BlockSpec((G, B, Hp), lambda g: (g, 0, 0)),
                pl.BlockSpec((G, B, Hp), lambda g: (g, 0, 0)),
                pl.BlockSpec((1, Hp), lambda g: (0, 0)),
                pl.BlockSpec((1, 1), lambda g: (0, 0)),
            ],
            out_specs=pl.BlockSpec((1, G, B, Hp), lambda g: (g, 0, 0, 0)),
        ),
        compiler_params=pltpu.CompilerParams(
            dimension_semantics=("parallel",),
            vmem_limit_bytes=_VMEM_LIMIT),
    )(h_f, h_b, w_att, b_att)


# --------------------------------------------------------------------------
# Intra_Group_LSTM (both groups batched along M = 2B, shared weights) with
# fc_last fused into the last time step.  Only the final state is produced
# (no per-step HBM writeback of hidden states).
# --------------------------------------------------------------------------
def group_lstm_fc_pallas(ggx, whh_g, w_fc, b_fc):
    T, BB, G4 = ggx.shape          # BB = 2 * B  (group1 rows then group2 rows)
    Hp = G4 // 4
    C = w_fc.shape[1]
    B = BB // 2

    def kernel(gx_ref, whh_hbm, wfc_ref, bfc_ref, feat_ref, out_ref,
               h_scr, c_scr, whh_vmem, sem):
        t = pl.program_id(0)

        @pl.when(t == 0)
        def _():
            cp = pltpu.make_async_copy(whh_hbm, whh_vmem, sem)
            cp.start()                         # overlap weight DMA with state init
            h_scr[...] = jnp.zeros_like(h_scr)
            c_scr[...] = jnp.zeros_like(c_scr)
            cp.wait()

        gates = gx_ref[0] + jnp.dot(h_scr[...].astype(whh_vmem.dtype),
                                    whh_vmem[...],
                                    preferred_element_type=jnp.float32)   # (2B, 4Hp)
        if_ = jax.nn.sigmoid(gates[:, 0:2 * Hp])                          # i | f fused
        g = jnp.tanh(gates[:, 2 * Hp:3 * Hp])
        o = jax.nn.sigmoid(gates[:, 3 * Hp:4 * Hp])
        c = if_[:, Hp:2 * Hp] * c_scr[...] + if_[:, 0:Hp] * g
        h = o * jnp.tanh(c)
        c_scr[...] = c
        h_scr[...] = h

        @pl.when(t == pl.num_programs(0) - 1)
        def _():
            g1 = h_scr[0:B, :]                                   # group 1 final state
            g2 = h_scr[B:2 * B, :]                               # group 2 final state
            feat = jnp.concatenate([g1, g2], axis=-1)            # (B, 2Hp)
            feat_ref[...] = feat
            out_ref[...] = (jnp.dot(feat.astype(wfc_ref.dtype), wfc_ref[...],
                                    preferred_element_type=jnp.float32)
                            + bfc_ref[...])

    return pl.pallas_call(
        kernel,
        out_shape=(jax.ShapeDtypeStruct((B, 2 * Hp), jnp.float32),
                   jax.ShapeDtypeStruct((B, C), jnp.float32)),
        grid_spec=pltpu.PrefetchScalarGridSpec(
            num_scalar_prefetch=0,
            grid=(T,),
            in_specs=[
                pl.BlockSpec((1, BB, 4 * Hp), lambda t: (t, 0, 0)),
                pl.BlockSpec(memory_space=pl.ANY),       # W_hh copied once to VMEM scratch
                pl.BlockSpec((2 * Hp, C), lambda t: (0, 0)),
                pl.BlockSpec((1, C), lambda t: (0, 0)),
            ],
            out_specs=(
                pl.BlockSpec((B, 2 * Hp), lambda t: (0, 0)),     # written at last step only
                pl.BlockSpec((B, C), lambda t: (0, 0)),
            ),
            scratch_shapes=[
                pltpu.VMEM((BB, Hp), jnp.float32),
                pltpu.VMEM((BB, Hp), jnp.float32),
                pltpu.VMEM((Hp, 4 * Hp), whh_g.dtype),
                pltpu.SemaphoreType.DMA(()),
            ],
        ),
        compiler_params=pltpu.CompilerParams(
            dimension_semantics=("arbitrary",),
            vmem_limit_bytes=_VMEM_LIMIT),
    )(ggx, whh_g, w_fc, b_fc)


# --------------------------------------------------------------------------
# Full pCTDM forward.
# --------------------------------------------------------------------------
def pctdm_forward(x, params, *, num_players, input_size, hidden_size):
    B = x.shape[0]
    P = num_players
    G = P // 2
    H = hidden_size
    whh_dir = params["whh_dir"]
    Hp = whh_dir.shape[1]

    x = x.reshape(B, P, input_size)

    # 1. Hoisted BiLSTM input projection (both directions, bias folded in).
    x2d = x.reshape(B * P, input_size).astype(jnp.bfloat16)
    gates2d = matmul_bias_pallas(x2d, params["wih_dir"], params["b_dir"])   # (B*P, 8Hp)
    gx = jnp.transpose(gates2d.reshape(B, P, 2, 4 * Hp), (2, 1, 0, 3))      # (2, P, B, 4Hp)
    gx = jnp.concatenate([gx[:1], gx[1:, ::-1]], axis=0)                    # reverse bwd time

    # 2. Fused bidirectional recurrence (single kernel, resident W_hh).
    h_f, h_b = bilstm_pallas(gx, whh_dir)                                   # (P, B, Hp) x2

    # 3. Fused early max-pooling + per-group attention scaling.
    scaled = pool_attn_pallas(h_f, h_b, params["w_att"], params["b_att"], G)  # (2, G, B, Hp)

    # 4. Hoisted Intra_Group_LSTM input projection (both groups in one matmul).
    s2d = scaled.reshape(-1, Hp).astype(jnp.bfloat16)                       # (2*G*B, Hp)
    ggates = matmul_bias_pallas(s2d, params["wih_g"], params["b_g"])        # (2*G*B, 4Hp)
    ggx = jnp.transpose(ggates.reshape(2, G, B, 4 * Hp),
                        (1, 0, 2, 3)).reshape(G, 2 * B, 4 * Hp)             # (G, 2B, 4Hp)

    # 5. Group LSTM (groups batched, shared weights) with fused fc_last.
    feat_p, logits = group_lstm_fc_pallas(ggx, params["whh_g"],
                                          params["w_fc"], params["b_fc"])

    if Hp != H:   # strip the lane padding from the returned features
        feat = jnp.concatenate([feat_p[:, :H], feat_p[:, Hp:Hp + H]], axis=1)
    else:
        feat = feat_p
    return feat, logits


# --------------------------------------------------------------------------
# Deterministic synthetic parameters (PyTorch-style uniform bounds), stored in
# the padded / gate-aligned / (mostly) bf16 layout expected by the kernels.
# --------------------------------------------------------------------------
def init_params(key, input_size, hidden_size, num_classes):
    H = hidden_size
    Hp = _round_up(H, 128)
    I = input_size
    C = num_classes
    ks = iter(jax.random.split(key, 32))

    def u(shape, bound):
        return jax.random.uniform(next(ks), shape, jnp.float32, -bound, bound)

    b_lstm = 1.0 / (H ** 0.5)
    b_fcb = 1.0 / ((2 * H) ** 0.5)

    def lstm_weights(in_dim):
        wih = u((in_dim, 4 * H), b_lstm)          # stored transposed: (in, 4H), i|f|g|o
        whh = u((H, 4 * H), b_lstm)
        bias = u((1, 4 * H), b_lstm) + u((1, 4 * H), b_lstm)     # b_ih + b_hh
        return wih, whh, bias

    wih_f, whh_f, bf_ = lstm_weights(I)           # BiLSTM forward direction
    wih_b, whh_b, bb_ = lstm_weights(I)           # BiLSTM backward direction
    wih_g, whh_g, bg_ = lstm_weights(H)           # Intra_Group_LSTM (shared)

    pg = lambda w: _pad_gate_cols(w, H, Hp)       # per-gate lane padding H -> Hp

    w_att = u((1, H), b_lstm)
    if Hp != H:
        w_att = jnp.pad(w_att, ((0, 0), (0, Hp - H)))

    params = dict(
        # BiLSTM: directions concatenated along the gate axis for one big matmul.
        wih_dir=jnp.concatenate([pg(wih_f), pg(wih_b)], axis=1).astype(jnp.bfloat16),
        b_dir=jnp.concatenate([pg(bf_), pg(bb_)], axis=1),
        whh_dir=jnp.stack([_pad_rows(pg(whh_f), H, Hp),
                           _pad_rows(pg(whh_b), H, Hp)], axis=0).astype(jnp.bfloat16),
        # Intra_Group_LSTM.
        wih_g=_pad_rows(pg(wih_g), H, Hp).astype(jnp.bfloat16),
        b_g=pg(bg_),
        whh_g=_pad_rows(pg(whh_g), H, Hp).astype(jnp.bfloat16),
        # attention Linear(H, 1)  (Dropout before it is identity at inference)
        w_att=w_att,
        b_att=u((1, 1), b_lstm),
        # fc_last Linear(2H, num_classes), rows padded per H-half.
        w_fc=jnp.concatenate([_pad_rows(u((H, C), b_fcb), H, Hp),
                              _pad_rows(u((H, C), b_fcb), H, Hp)],
                             axis=0).astype(jnp.bfloat16),
        b_fc=u((1, C), b_fcb),
    )
    return params


if __name__ == "__main__":
    # Small stand-ins for input_size=7096 / hidden_size=1000 (structure identical;
    # at real size H is padded 1000 -> 1024 by the same code path).
    INPUT_SIZE = 256
    HIDDEN = 128
    NUM_PLAYERS = 12      # 2 groups x 6, hard-coded by the module's forward
    NUM_CLASSES = 8
    BATCH = 2

    key = jax.random.PRNGKey(0)
    kp, kx = jax.random.split(key)
    params = init_params(kp, INPUT_SIZE, HIDDEN, NUM_CLASSES)
    x = jax.random.normal(kx, (BATCH, NUM_PLAYERS * INPUT_SIZE), jnp.float32)

    fwd = jax.jit(functools.partial(
        pctdm_forward,
        num_players=NUM_PLAYERS,
        input_size=INPUT_SIZE,
        hidden_size=HIDDEN,
    ))
    feat, out = fwd(x, params)
    jax.block_until_ready((feat, out))

    assert feat.shape == (BATCH, 2 * HIDDEN), feat.shape
    assert out.shape == (BATCH, NUM_CLASSES), out.shape
    assert bool(jnp.all(jnp.isfinite(feat))) and bool(jnp.all(jnp.isfinite(out)))
    print("KERNEL_OK")
</pallas_src>

<mosaic_0001>
module attributes {stable_mosaic.version = 11 : i64} {
  func.func @_matmul_bias_kernel(%arg0: i32, %arg1: i32, %arg2: i32, %arg3: memref<24x256xbf16, #tpu.memory_space<vmem>>, %arg4: memref<256x512xbf16, #tpu.memory_space<vmem>>, %arg5: memref<1x512xf32, #tpu.memory_space<vmem>>, %arg6: memref<24x512xf32, #tpu.memory_space<vmem>>, %arg7: memref<24x512xf32, #tpu.memory_space<vmem>>) attributes {dimension_semantics = [#tpu.dimension_semantics<parallel>, #tpu.dimension_semantics<parallel>, #tpu.dimension_semantics<arbitrary>], iteration_bounds = array<i64: 1, 2, 1>, scalar_prefetch = 0 : i64, scratch_operands = 1 : i64, tpu.core_type = #tpu.core_type<tc>, window_params = [{transform_indices = @transform_0, window_bounds = array<i64: 24, 256>}, {transform_indices = @transform_1, window_bounds = array<i64: 256, 512>}, {transform_indices = @transform_2, window_bounds = array<i64: 1, 512>}, {transform_indices = @transform_3, window_bounds = array<i64: 24, 512>}]} {
    %c0_i32 = arith.constant 0 : i32
    %0 = arith.cmpi eq, %arg2, %c0_i32 : i32
    %1 = arith.extui %0 : i1 to i32
    %c0_i32_0 = arith.constant 0 : i32
    %2 = arith.cmpi ne, %1, %c0_i32_0 : i32
    scf.if %2 {
      %cst_10 = arith.constant 0.000000e+00 : f32
      %12 = vector.broadcast %cst_10 : f32 to vector<24x512xf32>
      %c0_11 = arith.constant 0 : index
      %c0_12 = arith.constant 0 : index
      %13 = vector.load %arg7[%c0_11, %c0_12] : memref<24x512xf32, #tpu.memory_space<vmem>>, vector<24x512xf32>
      tpu.vector_store %arg7[%c0_11, %c0_12], %12 {strides = array<i32>} : memref<24x512xf32, #tpu.memory_space<vmem>>, vector<24x512xf32>,
    } else {
    }
    %c0 = arith.constant 0 : index
    %c0_1 = arith.constant 0 : index
    %3 = vector.load %arg7[%c0, %c0_1] : memref<24x512xf32, #tpu.memory_space<vmem>>, vector<24x512xf32>
    %c0_2 = arith.constant 0 : index
    %c0_3 = arith.constant 0 : index
    %4 = vector.load %arg3[%c0_2, %c0_3] : memref<24x256xbf16, #tpu.memory_space<vmem>>, vector<24x256xbf16>
    %c0_4 = arith.constant 0 : index
    %c0_5 = arith.constant 0 : index
    %5 = vector.load %arg4[%c0_4, %c0_5] : memref<256x512xbf16, #tpu.memory_space<vmem>>, vector<256x512xbf16>
    %cst = arith.constant dense<0.000000e+00> : vector<24x512xf32>
    %6 = tpu.matmul %4, %5, %cst {dimension_numbers = #tpu.dot_dimension_numbers<[1], [0], [0], [1], [0, 0, 1, 1], [], []>} : vector<24x256xbf16>, vector<256x512xbf16>, vector<24x512xf32> -> vector<24x512xf32>
    %7 = arith.addf %3, %6 : vector<24x512xf32>
    %c0_6 = arith.constant 0 : index
    %c0_7 = arith.constant 0 : index
    %8 = vector.load %arg7[%c0_6, %c0_7] : memref<24x512xf32, #tpu.memory_space<vmem>>, vector<24x512xf32>
    tpu.vector_store %arg7[%c0_6, %c0_7], %7 {strides = array<i32>} : memref<24x512xf32, #tpu.memory_space<vmem>>, vector<24x512xf32>,
    %c0_i32_8 = arith.constant 0 : i32
    %9 = arith.cmpi eq, %arg2, %c0_i32_8 : i32
    %10 = arith.extui %9 : i1 to i32
    %c0_i32_9 = arith.constant 0 : i32
    %11 = arith.cmpi ne, %10, %c0_i32_9 : i32
    scf.if %11 {
      %c0_10 = arith.constant 0 : index
      %c0_11 = arith.constant 0 : index
      %12 = vector.load %arg7[%c0_10, %c0_11] : memref<24x512xf32, #tpu.memory_space<vmem>>, vector<24x512xf32>
      %c0_12 = arith.constant 0 : index
      %c0_13 = arith.constant 0 : index
      %13 = vector.load %arg5[%c0_12, %c0_13] : memref<1x512xf32, #tpu.memory_space<vmem>>, vector<1x512xf32>
      %14 = vector.broadcast %13 : vector<1x512xf32> to vector<24x512xf32>
      %15 = arith.addf %12, %14 : vector<24x512xf32>
      %c0_14 = arith.constant 0 : index
      %c0_15 = arith.constant 0 : index
      %16 = vector.load %arg6[%c0_14, %c0_15] : memref<24x512xf32, #tpu.memory_space<vmem>>, vector<24x512xf32>
      tpu.vector_store %arg6[%c0_14, %c0_15], %15 {strides = array<i32>} : memref<24x512xf32, #tpu.memory_space<vmem>>, vector<24x512xf32>,
    } else {
    }
    return
  }
  func.func @transform_0(%arg0: i32, %arg1: i32, %arg2: i32) -> (i32, i32) {
    %c0_i32 = arith.constant 0 : i32
    return %arg0, %arg2 : i32, i32
  }
  func.func @transform_1(%arg0: i32, %arg1: i32, %arg2: i32) -> (i32, i32) {
    %c0_i32 = arith.constant 0 : i32
    return %arg2, %arg1 : i32, i32
  }
  func.func @transform_2(%arg0: i32, %arg1: i32, %arg2: i32) -> (i32, i32) {
    %c0_i32 = arith.constant 0 : i32
    %c0_i32_0 = arith.constant 0 : i32
    return %c0_i32, %arg1 : i32, i32
  }
  func.func @transform_3(%arg0: i32, %arg1: i32, %arg2: i32) -> (i32, i32) {
    %c0_i32 = arith.constant 0 : i32
    return %arg0, %arg1 : i32, i32
  }
}

module attributes {stable_mosaic.version = 11 : i64} {
  func.func @kernel(%arg0: i32, %arg1: memref<2x1x2x512xf32, #tpu.memory_space<vmem>>, %arg2: memref<2x128x512xbf16, #tpu.memory_space<any>>, %arg3: memref<1x2x128xf32, #tpu.memory_space<vmem>>, %arg4: memref<1x2x128xf32, #tpu.memory_space<vmem>>, %arg5: memref<2x2x128xf32, #tpu.memory_space<vmem>>, %arg6: memref<2x2x128xf32, #tpu.memory_space<vmem>>, %arg7: memref<2x128x512xbf16, #tpu.memory_space<vmem>>, %arg8: memref<!tpu.dma_semaphore, #tpu.memory_space<semaphore_mem>>) attributes {dimension_semantics = [#tpu.dimension_semantics<arbitrary>], iteration_bounds = array<i64: 12>, scalar_prefetch = 0 : i64, scratch_operands = 4 : i64, tpu.core_type = #tpu.core_type<tc>, window_params = [{transform_indices = @transform_0, window_bounds = array<i64: 2, 1, 2, 512>}, {}, {transform_indices = @transform_2, window_bounds = array<i64: 1, 2, 128>}, {transform_indices = @transform_3, window_bounds = array<i64: 1, 2, 128>}]} {
    %c0_i32 = arith.constant 0 : i32
    %0 = arith.cmpi eq, %arg0, %c0_i32 : i32
    %1 = arith.extui %0 : i1 to i32
    %c0_i32_0 = arith.constant 0 : i32
    %2 = arith.cmpi ne, %1, %c0_i32_0 : i32
    scf.if %2 {
      tpu.enqueue_dma source(%arg2 : memref<2x128x512xbf16, #tpu.memory_space<any>>) target(%arg7 : memref<2x128x512xbf16, #tpu.memory_space<vmem>>) target_semaphore(%arg8 : memref<!tpu.dma_semaphore, #tpu.memory_space<semaphore_mem>>)
      %cst_48 = arith.constant 0.000000e+00 : f32
      %85 = vector.broadcast %cst_48 : f32 to vector<2x2x128xf32>
      %c0_49 = arith.constant 0 : index
      %c0_50 = arith.constant 0 : index
      %c0_51 = arith.constant 0 : index
      %86 = vector.load %arg5[%c0_49, %c0_50, %c0_51] : memref<2x2x128xf32, #tpu.memory_space<vmem>>, vector<2x2x128xf32>
      tpu.vector_store %arg5[%c0_49, %c0_50, %c0_51], %85 {strides = array<i32>} : memref<2x2x128xf32, #tpu.memory_space<vmem>>, vector<2x2x128xf32>,
      %cst_52 = arith.constant 0.000000e+00 : f32
      %87 = vector.broadcast %cst_52 : f32 to vector<2x2x128xf32>
      %c0_53 = arith.constant 0 : index
      %c0_54 = arith.constant 0 : index
      %c0_55 = arith.constant 0 : index
      %88 = vector.load %arg6[%c0_53, %c0_54, %c0_55] : memref<2x2x128xf32, #tpu.memory_space<vmem>>, vector<2x2x128xf32>
      tpu.vector_store %arg6[%c0_53, %c0_54, %c0_55], %87 {strides = array<i32>} : memref<2x2x128xf32, #tpu.memory_space<vmem>>, vector<2x2x128xf32>,
      tpu.wait_dma2 semaphore(%arg8 : memref<!tpu.dma_semaphore, #tpu.memory_space<semaphore_mem>>) src(%arg2 : memref<2x128x512xbf16, #tpu.memory_space<any>>) dst(%arg7 : memref<2x128x512xbf16, #tpu.memory_space<vmem>>)
    } else {
    }
    %c0 = arith.constant 0 : index
    %c0_1 = arith.constant 0 : index
    %c0_2 = arith.constant 0 : index
    %c0_3 = arith.constant 0 : index
    %3 = vector.load %arg1[%c0, %c0_1, %c0_2, %c0_3] : memref<2x1x2x512xf32, #tpu.memory_space<vmem>>, vector<1x1x2x512xf32>
    %4 = vector.shape_cast %3 : vector<1x1x2x512xf32> to vector<2x512xf32>
    %c0_4 = arith.constant 0 : index
    %c0_5 = arith.constant 0 : index
    %c0_6 = arith.constant 0 : index
    %5 = vector.load %arg5[%c0_4, %c0_5, %c0_6] : memref<2x2x128xf32, #tpu.memory_space<vmem>>, vector<1x2x128xf32>
    %6 = vector.shape_cast %5 : vector<1x2x128xf32> to vector<2x128xf32>
    %7 = arith.truncf %6 : vector<2x128xf32> to vector<2x128xbf16>
    %c0_7 = arith.constant 0 : index
    %c0_8 = arith.constant 0 : index
    %c0_9 = arith.constant 0 : index
    %8 = vector.load %arg7[%c0_7, %c0_8, %c0_9] : memref<2x128x512xbf16, #tpu.memory_space<vmem>>, vector<1x128x512xbf16>
    %9 = vector.shape_cast %8 : vector<1x128x512xbf16> to vector<128x512xbf16>
    %cst = arith.constant dense<0.000000e+00> : vector<2x512xf32>
    %10 = tpu.matmul %7, %9, %cst {dimension_numbers = #tpu.dot_dimension_numbers<[1], [0], [0], [1], [0, 0, 1, 1], [], []>} : vector<2x128xbf16>, vector<128x512xbf16>, vector<2x512xf32> -> vector<2x512xf32>
    %11 = arith.addf %4, %10 : vector<2x512xf32>
    %12 = vector.extract_strided_slice %11 {offsets = [0, 0], sizes = [2, 256], strides = [1, 1]} : vector<2x512xf32> to vector<2x256xf32>
    %13 = arith.negf %12 : vector<2x256xf32>
    %14 = math.exp %13 : vector<2x256xf32>
    %cst_10 = arith.constant 1.000000e+00 : f32
    %15 = vector.broadcast %cst_10 : f32 to vector<2x256xf32>
    %16 = arith.addf %15, %14 : vector<2x256xf32>
    %17 = arith.divf %15, %16 : vector<2x256xf32>
    %18 = vector.extract_strided_slice %11 {offsets = [0, 256], sizes = [2, 128], strides = [1, 1]} : vector<2x512xf32> to vector<2x128xf32>
    %19 = math.tanh %18 : vector<2x128xf32>
    %20 = vector.extract_strided_slice %11 {offsets = [0, 384], sizes = [2, 128], strides = [1, 1]} : vector<2x512xf32> to vector<2x128xf32>
    %21 = arith.negf %20 : vector<2x128xf32>
    %22 = math.exp %21 : vector<2x128xf32>
    %cst_11 = arith.constant 1.000000e+00 : f32
    %23 = vector.broadcast %cst_11 : f32 to vector<2x128xf32>
    %24 = arith.addf %23, %22 : vector<2x128xf32>
    %25 = arith.divf %23, %24 : vector<2x128xf32>
    %26 = vector.extract_strided_slice %17 {offsets = [0, 128], sizes = [2, 128], strides = [1, 1]} : vector<2x256xf32> to vector<2x128xf32>
    %c0_12 = arith.constant 0 : index
    %c0_13 = arith.constant 0 : index
    %c0_14 = arith.constant 0 : index
    %27 = vector.load %arg6[%c0_12, %c0_13, %c0_14] : memref<2x2x128xf32, #tpu.memory_space<vmem>>, vector<1x2x128xf32>
    %28 = vector.shape_cast %27 : vector<1x2x128xf32> to vector<2x128xf32>
    %29 = arith.mulf %26, %28 : vector<2x128xf32>
    %30 = vector.extract_strided_slice %17 {offsets = [0, 0], sizes = [2, 128], strides = [1, 1]} : vector<2x256xf32> to vector<2x128xf32>
    %31 = arith.mulf %30, %19 : vector<2x128xf32>
    %32 = arith.addf %29, %31 : vector<2x128xf32>
    %33 = math.tanh %32 : vector<2x128xf32>
    %34 = arith.mulf %25, %33 : vector<2x128xf32>
    %c0_15 = arith.constant 0 : index
    %c0_16 = arith.constant 0 : index
    %c0_17 = arith.constant 0 : index
    %35 = vector.load %arg6[%c0_15, %c0_16, %c0_17] : memref<2x2x128xf32, #tpu.memory_space<vmem>>, vector<1x2x128xf32>
    %36 = vector.shape_cast %35 : vector<1x2x128xf32> to vector<2x128xf32>
    %37 = vector.shape_cast %32 : vector<2x128xf32> to vector<1x2x128xf32>
    tpu.vector_store %arg6[%c0_15, %c0_16, %c0_17], %37 {strides = array<i32>} : memref<2x2x128xf32, #tpu.memory_space<vmem>>, vector<1x2x128xf32>,
    %c0_18 = arith.constant 0 : index
    %c0_19 = arith.constant 0 : index
    %c0_20 = arith.constant 0 : index
    %38 = vector.load %arg5[%c0_18, %c0_19, %c0_20] : memref<2x2x128xf32, #tpu.memory_space<vmem>>, vector<1x2x128xf32>
    %39 = vector.shape_cast %38 : vector<1x2x128xf32> to vector<2x128xf32>
    %40 = vector.shape_cast %34 : vector<2x128xf32> to vector<1x2x128xf32>
    tpu.vector_store %arg5[%c0_18, %c0_19, %c0_20], %40 {strides = array<i32>} : memref<2x2x128xf32, #tpu.memory_space<vmem>>, vector<1x2x128xf32>,
    %c1 = arith.constant 1 : index
    %c0_21 = arith.constant 0 : index
    %c0_22 = arith.constant 0 : index
    %c0_23 = arith.constant 0 : index
    %41 = vector.load %arg1[%c1, %c0_21, %c0_22, %c0_23] : memref<2x1x2x512xf32, #tpu.memory_space<vmem>>, vector<1x1x2x512xf32>
    %42 = vector.shape_cast %41 : vector<1x1x2x512xf32> to vector<2x512xf32>
    %c1_24 = arith.constant 1 : index
    %c0_25 = arith.constant 0 : index
    %c0_26 = arith.constant 0 : index
    %43 = vector.load %arg5[%c1_24, %c0_25, %c0_26] : memref<2x2x128xf32, #tpu.memory_space<vmem>>, vector<1x2x128xf32>
    %44 = vector.shape_cast %43 : vector<1x2x128xf32> to vector<2x128xf32>
    %45 = arith.truncf %44 : vector<2x128xf32> to vector<2x128xbf16>
    %c1_27 = arith.constant 1 : index
    %c0_28 = arith.constant 0 : index
    %c0_29 = arith.constant 0 : index
    %46 = vector.load %arg7[%c1_27, %c0_28, %c0_29] : memref<2x128x512xbf16, #tpu.memory_space<vmem>>, vector<1x128x512xbf16>
    %47 = vector.shape_cast %46 : vector<1x128x512xbf16> to vector<128x512xbf16>
    %cst_30 = arith.constant dense<0.000000e+00> : vector<2x512xf32>
    %48 = tpu.matmul %45, %47, %cst_30 {dimension_numbers = #tpu.dot_dimension_numbers<[1], [0], [0], [1], [0, 0, 1, 1], [], []>} : vector<2x128xbf16>, vector<128x512xbf16>, vector<2x512xf32> -> vector<2x512xf32>
    %49 = arith.addf %42, %48 : vector<2x512xf32>
    %50 = vector.extract_strided_slice %49 {offsets = [0, 0], sizes = [2, 256], strides = [1, 1]} : vector<2x512xf32> to vector<2x256xf32>
    %51 = arith.negf %50 : vector<2x256xf32>
    %52 = math.exp %51 : vector<2x256xf32>
    %cst_31 = arith.constant 1.000000e+00 : f32
    %53 = vector.broadcast %cst_31 : f32 to vector<2x256xf32>
    %54 = arith.addf %53, %52 : vector<2x256xf32>
    %55 = arith.divf %53, %54 : vector<2x256xf32>
    %56 = vector.extract_strided_slice %49 {offsets = [0, 256], sizes = [2, 128], strides = [1, 1]} : vector<2x512xf32> to vector<2x128xf32>
    %57 = math.tanh %56 : vector<2x128xf32>
    %58 = vector.extract_strided_slice %49 {offsets = [0, 384], sizes = [2, 128], strides = [1, 1]} : vector<2x512xf32> to vector<2x128xf32>
    %59 = arith.negf %58 : vector<2x128xf32>
    %60 = math.exp %59 : vector<2x128xf32>
    %cst_32 = arith.constant 1.000000e+00 : f32
    %61 = vector.broadcast %cst_32 : f32 to vector<2x128xf32>
    %62 = arith.addf %61, %60 : vector<2x128xf32>
    %63 = arith.divf %61, %62 : vector<2x128xf32>
    %64 = vector.extract_strided_slice %55 {offsets = [0, 128], sizes = [2, 128], strides = [1, 1]} : vector<2x256xf32> to vector<2x128xf32>
    %c1_33 = arith.constant 1 : index
    %c0_34 = arith.constant 0 : index
    %c0_35 = arith.constant 0 : index
    %65 = vector.load %arg6[%c1_33, %c0_34, %c0_35] : memref<2x2x128xf32, #tpu.memory_space<vmem>>, vector<1x2x128xf32>
    %66 = vector.shape_cast %65 : vector<1x2x128xf32> to vector<2x128xf32>
    %67 = arith.mulf %64, %66 : vector<2x128xf32>
    %68 = vector.extract_strided_slice %55 {offsets = [0, 0], sizes = [2, 128], strides = [1, 1]} : vector<2x256xf32> to vector<2x128xf32>
    %69 = arith.mulf %68, %57 : vector<2x128xf32>
    %70 = arith.addf %67, %69 : vector<2x128xf32>
    %71 = math.tanh %70 : vector<2x128xf32>
    %72 = arith.mulf %63, %71 : vector<2x128xf32>
    %c1_36 = arith.constant 1 : index
    %c0_37 = arith.constant 0 : index
    %c0_38 = arith.constant 0 : index
    %73 = vector.load %arg6[%c1_36, %c0_37, %c0_38] : memref<2x2x128xf32, #tpu.memory_space<vmem>>, vector<1x2x128xf32>
    %74 = vector.shape_cast %73 : vector<1x2x128xf32> to vector<2x128xf32>
    %75 = vector.shape_cast %70 : vector<2x128xf32> to vector<1x2x128xf32>
    tpu.vector_store %arg6[%c1_36, %c0_37, %c0_38], %75 {strides = array<i32>} : memref<2x2x128xf32, #tpu.memory_space<vmem>>, vector<1x2x128xf32>,
    %c1_39 = arith.constant 1 : index
    %c0_40 = arith.constant 0 : index
    %c0_41 = arith.constant 0 : index
    %76 = vector.load %arg5[%c1_39, %c0_40, %c0_41] : memref<2x2x128xf32, #tpu.memory_space<vmem>>, vector<1x2x128xf32>
    %77 = vector.shape_cast %76 : vector<1x2x128xf32> to vector<2x128xf32>
    %78 = vector.shape_cast %72 : vector<2x128xf32> to vector<1x2x128xf32>
    tpu.vector_store %arg5[%c1_39, %c0_40, %c0_41], %78 {strides = array<i32>} : memref<2x2x128xf32, #tpu.memory_space<vmem>>, vector<1x2x128xf32>,
    %c0_42 = arith.constant 0 : index
    %c0_43 = arith.constant 0 : index
    %c0_44 = arith.constant 0 : index
    %79 = vector.load %arg3[%c0_42, %c0_43, %c0_44] : memref<1x2x128xf32, #tpu.memory_space<vmem>>, vector<1x2x128xf32>
    %80 = vector.shape_cast %79 : vector<1x2x128xf32> to vector<2x128xf32>
    %81 = vector.shape_cast %34 : vector<2x128xf32> to vector<1x2x128xf32>
    tpu.vector_store %arg3[%c0_42, %c0_43, %c0_44], %81 {strides = array<i32>} : memref<1x2x128xf32, #tpu.memory_space<vmem>>, vector<1x2x128xf32>,
    %c0_45 = arith.constant 0 : index
    %c0_46 = arith.constant 0 : index
    %c0_47 = arith.constant 0 : index
    %82 = vector.load %arg4[%c0_45, %c0_46, %c0_47] : memref<1x2x128xf32, #tpu.memory_space<vmem>>, vector<1x2x128xf32>
    %83 = vector.shape_cast %82 : vector<1x2x128xf32> to vector<2x128xf32>
    %84 = vector.shape_cast %72 : vector<2x128xf32> to vector<1x2x128xf32>
    tpu.vector_store %arg4[%c0_45, %c0_46, %c0_47], %84 {strides = array<i32>} : memref<1x2x128xf32, #tpu.memory_space<vmem>>, vector<1x2x128xf32>,
    return
  }
  func.func @transform_0(%arg0: i32) -> (i32, i32, i32, i32) {
    %c0_i32 = arith.constant 0 : i32
    %c0_i32_0 = arith.constant 0 : i32
    %c0_i32_1 = arith.constant 0 : i32
    %c0_i32_2 = arith.constant 0 : i32
    return %c0_i32, %arg0, %c0_i32_0, %c0_i32_1 : i32, i32, i32, i32
  }
  func.func @transform_2(%arg0: i32) -> (i32, i32, i32) {
    %c0_i32 = arith.constant 0 : i32
    %c0_i32_0 = arith.constant 0 : i32
    %c0_i32_1 = arith.constant 0 : i32
    return %arg0, %c0_i32, %c0_i32_0 : i32, i32, i32
  }
  func.func @transform_3(%arg0: i32) -> (i32, i32, i32) {
    %c11_i32 = arith.constant 11 : i32
    %0 = arith.subi %c11_i32, %arg0 : i32
    %c0_i32 = arith.constant 0 : i32
    %c0_i32_0 = arith.constant 0 : i32
    %c0_i32_1 = arith.constant 0 : i32
    return %0, %c0_i32, %c0_i32_0 : i32, i32, i32
  }
}

module attributes {stable_mosaic.version = 11 : i64} {
  func.func @kernel(%arg0: i32, %arg1: memref<6x2x128xf32, #tpu.memory_space<vmem>>, %arg2: memref<6x2x128xf32, #tpu.memory_space<vmem>>, %arg3: memref<1x128xf32, #tpu.memory_space<vmem>>, %arg4: memref<1x1xf32, #tpu.memory_space<vmem>>, %arg5: memref<1x6x2x128xf32, #tpu.memory_space<vmem>>) attributes {dimension_semantics = [#tpu.dimension_semantics<parallel>], iteration_bounds = array<i64: 2>, scalar_prefetch = 0 : i64, scratch_operands = 0 : i64, tpu.core_type = #tpu.core_type<tc>, window_params = [{transform_indices = @transform_0, window_bounds = array<i64: 6, 2, 128>}, {transform_indices = @transform_1, window_bounds = array<i64: 6, 2, 128>}, {pipeline_mode = #tpu.pipeline_mode<synchronous>, transform_indices = @transform_2, window_bounds = array<i64: 1, 128>}, {pipeline_mode = #tpu.pipeline_mode<synchronous>, transform_indices = @transform_3, window_bounds = array<i64: 1, 1>}, {transform_indices = @transform_4, window_bounds = array<i64: 1, 6, 2, 128>}]} {
    %c0 = arith.constant 0 : index
    %c0_0 = arith.constant 0 : index
    %c0_1 = arith.constant 0 : index
    %0 = vector.load %arg1[%c0, %c0_0, %c0_1] : memref<6x2x128xf32, #tpu.memory_space<vmem>>, vector<6x2x128xf32>
    %c0_2 = arith.constant 0 : index
    %c0_3 = arith.constant 0 : index
    %c0_4 = arith.constant 0 : index
    %1 = vector.load %arg2[%c0_2, %c0_3, %c0_4] : memref<6x2x128xf32, #tpu.memory_space<vmem>>, vector<6x2x128xf32>
    %2 = arith.maximumf %0, %1 : vector<6x2x128xf32>
    %c0_5 = arith.constant 0 : index
    %c0_6 = arith.constant 0 : index
    %3 = vector.load %arg3[%c0_5, %c0_6] : memref<1x128xf32, #tpu.memory_space<vmem>>, vector<1x128xf32>
    %4 = vector.shape_cast %3 : vector<1x128xf32> to vector<1x1x128xf32>
    %5 = vector.broadcast %4 : vector<1x1x128xf32> to vector<6x2x128xf32>
    %6 = arith.mulf %2, %5 : vector<6x2x128xf32>
    %cst = arith.constant dense<0.000000e+00> : vector<6x2xf32>
    %7 = vector.multi_reduction <add>, %6, %cst [2] : vector<6x2x128xf32> to vector<6x2xf32>
    %8 = vector.shape_cast %7 : vector<6x2xf32> to vector<6x2x1xf32>
    %c0_7 = arith.constant 0 : index
    %c0_8 = arith.constant 0 : index
    %9 = vector.load %arg4[%c0_7, %c0_8] : memref<1x1xf32, #tpu.memory_space<vmem>>, vector<1x1xf32>
    %10 = vector.shape_cast %9 : vector<1x1xf32> to vector<1x1x1xf32>
    %11 = vector.broadcast %10 : vector<1x1x1xf32> to vector<6x2x1xf32>
    %12 = arith.addf %8, %11 : vector<6x2x1xf32>
    %cst_9 = arith.constant dense<0xFF800000> : vector<2x1xf32>
    %13 = vector.multi_reduction <maximumf>, %12, %cst_9 [0] : vector<6x2x1xf32> to vector<2x1xf32>
    %14 = vector.shape_cast %13 : vector<2x1xf32> to vector<1x2x1xf32>
    %15 = vector.broadcast %14 : vector<1x2x1xf32> to vector<6x2x1xf32>
    %16 = arith.subf %12, %15 : vector<6x2x1xf32>
    %17 = math.exp %16 : vector<6x2x1xf32>
    %cst_10 = arith.constant dense<0.000000e+00> : vector<2x1xf32>
    %18 = vector.multi_reduction <add>, %17, %cst_10 [0] : vector<6x2x1xf32> to vector<2x1xf32>
    %19 = vector.shape_cast %18 : vector<2x1xf32> to vector<1x2x1xf32>
    %20 = vector.broadcast %19 : vector<1x2x1xf32> to vector<6x2x1xf32>
    %21 = arith.divf %17, %20 : vector<6x2x1xf32>
    %22 = vector.broadcast %21 : vector<6x2x1xf32> to vector<6x2x128xf32>
    %23 = arith.mulf %2, %22 : vector<6x2x128xf32>
    %c0_11 = arith.constant 0 : index
    %c0_12 = arith.constant 0 : index
    %c0_13 = arith.constant 0 : index
    %c0_14 = arith.constant 0 : index
    %24 = vector.load %arg5[%c0_11, %c0_12, %c0_13, %c0_14] : memref<1x6x2x128xf32, #tpu.memory_space<vmem>>, vector<1x6x2x128xf32>
    %25 = vector.shape_cast %24 : vector<1x6x2x128xf32> to vector<6x2x128xf32>
    %26 = vector.shape_cast %23 : vector<6x2x128xf32> to vector<1x6x2x128xf32>
    tpu.vector_store %arg5[%c0_11, %c0_12, %c0_13, %c0_14], %26 {strides = array<i32>} : memref<1x6x2x128xf32, #tpu.memory_space<vmem>>, vector<1x6x2x128xf32>,
    return
  }
  func.func @transform_0(%arg0: i32) -> (i32, i32, i32) {
    %c0_i32 = arith.constant 0 : i32
    %c0_i32_0 = arith.constant 0 : i32
    %c0_i32_1 = arith.constant 0 : i32
    return %arg0, %c0_i32, %c0_i32_0 : i32, i32, i32
  }
  func.func @transform_1(%arg0: i32) -> (i32, i32, i32) {
    %c0_i32 = arith.constant 0 : i32
    %c0_i32_0 = arith.constant 0 : i32
    %c0_i32_1 = arith.constant 0 : i32
    return %arg0, %c0_i32, %c0_i32_0 : i32, i32, i32
  }
  func.func @transform_2(%arg0: i32) -> (i32, i32) {
    %c0_i32 = arith.constant 0 : i32
    %c0_i32_0 = arith.constant 0 : i32
    %c0_i32_1 = arith.constant 0 : i32
    return %c0_i32, %c0_i32_0 : i32, i32
  }
  func.func @transform_3(%arg0: i32) -> (i32, i32) {
    %c0_i32 = arith.constant 0 : i32
    %c0_i32_0 = arith.constant 0 : i32
    %c0_i32_1 = arith.constant 0 : i32
    return %c0_i32, %c0_i32_0 : i32, i32
  }
  func.func @transform_4(%arg0: i32) -> (i32, i32, i32, i32) {
    %c0_i32 = arith.constant 0 : i32
    %c0_i32_0 = arith.constant 0 : i32
    %c0_i32_1 = arith.constant 0 : i32
    %c0_i32_2 = arith.constant 0 : i32
    return %arg0, %c0_i32, %c0_i32_0, %c0_i32_1 : i32, i32, i32, i32
  }
}

module attributes {stable_mosaic.version = 11 : i64} {
  func.func @_matmul_bias_kernel(%arg0: i32, %arg1: i32, %arg2: i32, %arg3: memref<24x128xbf16, #tpu.memory_space<vmem>>, %arg4: memref<128x512xbf16, #tpu.memory_space<vmem>>, %arg5: memref<1x512xf32, #tpu.memory_space<vmem>>, %arg6: memref<24x512xf32, #tpu.memory_space<vmem>>, %arg7: memref<24x512xf32, #tpu.memory_space<vmem>>) attributes {dimension_semantics = [#tpu.dimension_semantics<parallel>, #tpu.dimension_semantics<parallel>, #tpu.dimension_semantics<arbitrary>], iteration_bounds = array<i64: 1, 1, 1>, scalar_prefetch = 0 : i64, scratch_operands = 1 : i64, tpu.core_type = #tpu.core_type<tc>, window_params = [{transform_indices = @transform_0, window_bounds = array<i64: 24, 128>}, {transform_indices = @transform_1, window_bounds = array<i64: 128, 512>}, {transform_indices = @transform_2, window_bounds = array<i64: 1, 512>}, {transform_indices = @transform_3, window_bounds = array<i64: 24, 512>}]} {
    %c0_i32 = arith.constant 0 : i32
    %0 = arith.cmpi eq, %arg2, %c0_i32 : i32
    %1 = arith.extui %0 : i1 to i32
    %c0_i32_0 = arith.constant 0 : i32
    %2 = arith.cmpi ne, %1, %c0_i32_0 : i32
    scf.if %2 {
      %cst_10 = arith.constant 0.000000e+00 : f32
      %12 = vector.broadcast %cst_10 : f32 to vector<24x512xf32>
      %c0_11 = arith.constant 0 : index
      %c0_12 = arith.constant 0 : index
      %13 = vector.load %arg7[%c0_11, %c0_12] : memref<24x512xf32, #tpu.memory_space<vmem>>, vector<24x512xf32>
      tpu.vector_store %arg7[%c0_11, %c0_12], %12 {strides = array<i32>} : memref<24x512xf32, #tpu.memory_space<vmem>>, vector<24x512xf32>,
    } else {
    }
    %c0 = arith.constant 0 : index
    %c0_1 = arith.constant 0 : index
    %3 = vector.load %arg7[%c0, %c0_1] : memref<24x512xf32, #tpu.memory_space<vmem>>, vector<24x512xf32>
    %c0_2 = arith.constant 0 : index
    %c0_3 = arith.constant 0 : index
    %4 = vector.load %arg3[%c0_2, %c0_3] : memref<24x128xbf16, #tpu.memory_space<vmem>>, vector<24x128xbf16>
    %c0_4 = arith.constant 0 : index
    %c0_5 = arith.constant 0 : index
    %5 = vector.load %arg4[%c0_4, %c0_5] : memref<128x512xbf16, #tpu.memory_space<vmem>>, vector<128x512xbf16>
    %cst = arith.constant dense<0.000000e+00> : vector<24x512xf32>
    %6 = tpu.matmul %4, %5, %cst {dimension_numbers = #tpu.dot_dimension_numbers<[1], [0], [0], [1], [0, 0, 1, 1], [], []>} : vector<24x128xbf16>, vector<128x512xbf16>, vector<24x512xf32> -> vector<24x512xf32>
    %7 = arith.addf %3, %6 : vector<24x512xf32>
    %c0_6 = arith.constant 0 : index
    %c0_7 = arith.constant 0 : index
    %8 = vector.load %arg7[%c0_6, %c0_7] : memref<24x512xf32, #tpu.memory_space<vmem>>, vector<24x512xf32>
    tpu.vector_store %arg7[%c0_6, %c0_7], %7 {strides = array<i32>} : memref<24x512xf32, #tpu.memory_space<vmem>>, vector<24x512xf32>,
    %c0_i32_8 = arith.constant 0 : i32
    %9 = arith.cmpi eq, %arg2, %c0_i32_8 : i32
    %10 = arith.extui %9 : i1 to i32
    %c0_i32_9 = arith.constant 0 : i32
    %11 = arith.cmpi ne, %10, %c0_i32_9 : i32
    scf.if %11 {
      %c0_10 = arith.constant 0 : index
      %c0_11 = arith.constant 0 : index
      %12 = vector.load %arg7[%c0_10, %c0_11] : memref<24x512xf32, #tpu.memory_space<vmem>>, vector<24x512xf32>
      %c0_12 = arith.constant 0 : index
      %c0_13 = arith.constant 0 : index
      %13 = vector.load %arg5[%c0_12, %c0_13] : memref<1x512xf32, #tpu.memory_space<vmem>>, vector<1x512xf32>
      %14 = vector.broadcast %13 : vector<1x512xf32> to vector<24x512xf32>
      %15 = arith.addf %12, %14 : vector<24x512xf32>
      %c0_14 = arith.constant 0 : index
      %c0_15 = arith.constant 0 : index
      %16 = vector.load %arg6[%c0_14, %c0_15] : memref<24x512xf32, #tpu.memory_space<vmem>>, vector<24x512xf32>
      tpu.vector_store %arg6[%c0_14, %c0_15], %15 {strides = array<i32>} : memref<24x512xf32, #tpu.memory_space<vmem>>, vector<24x512xf32>,
    } else {
    }
    return
  }
  func.func @transform_0(%arg0: i32, %arg1: i32, %arg2: i32) -> (i32, i32) {
    %c0_i32 = arith.constant 0 : i32
    return %arg0, %arg2 : i32, i32
  }
  func.func @transform_1(%arg0: i32, %arg1: i32, %arg2: i32) -> (i32, i32) {
    %c0_i32 = arith.constant 0 : i32
    return %arg2, %arg1 : i32, i32
  }
  func.func @transform_2(%arg0: i32, %arg1: i32, %arg2: i32) -> (i32, i32) {
    %c0_i32 = arith.constant 0 : i32
    %c0_i32_0 = arith.constant 0 : i32
    return %c0_i32, %arg1 : i32, i32
  }
  func.func @transform_3(%arg0: i32, %arg1: i32, %arg2: i32) -> (i32, i32) {
    %c0_i32 = arith.constant 0 : i32
    return %arg0, %arg1 : i32, i32
  }
}

module attributes {stable_mosaic.version = 11 : i64} {
  func.func @kernel(%arg0: i32, %arg1: memref<1x4x512xf32, #tpu.memory_space<vmem>>, %arg2: memref<128x512xbf16, #tpu.memory_space<any>>, %arg3: memref<256x8xbf16, #tpu.memory_space<vmem>>, %arg4: memref<1x8xf32, #tpu.memory_space<vmem>>, %arg5: memref<2x256xf32, #tpu.memory_space<vmem>>, %arg6: memref<2x8xf32, #tpu.memory_space<vmem>>, %arg7: memref<4x128xf32, #tpu.memory_space<vmem>>, %arg8: memref<4x128xf32, #tpu.memory_space<vmem>>, %arg9: memref<128x512xbf16, #tpu.memory_space<vmem>>, %arg10: memref<!tpu.dma_semaphore, #tpu.memory_space<semaphore_mem>>) attributes {dimension_semantics = [#tpu.dimension_semantics<arbitrary>], iteration_bounds = array<i64: 6>, scalar_prefetch = 0 : i64, scratch_operands = 4 : i64, tpu.core_type = #tpu.core_type<tc>, window_params = [{transform_indices = @transform_0, window_bounds = array<i64: 1, 4, 512>}, {}, {pipeline_mode = #tpu.pipeline_mode<synchronous>, transform_indices = @transform_2, window_bounds = array<i64: 256, 8>}, {pipeline_mode = #tpu.pipeline_mode<synchronous>, transform_indices = @transform_3, window_bounds = array<i64: 1, 8>}, {pipeline_mode = #tpu.pipeline_mode<synchronous>, transform_indices = @transform_4, window_bounds = array<i64: 2, 256>}, {pipeline_mode = #tpu.pipeline_mode<synchronous>, transform_indices = @transform_5, window_bounds = array<i64: 2, 8>}]} {
    %c0_i32 = arith.constant 0 : i32
    %0 = arith.cmpi eq, %arg0, %c0_i32 : i32
    %1 = arith.extui %0 : i1 to i32
    %c0_i32_0 = arith.constant 0 : i32
    %2 = arith.cmpi ne, %1, %c0_i32_0 : i32
    scf.if %2 {
      tpu.enqueue_dma source(%arg2 : memref<128x512xbf16, #tpu.memory_space<any>>) target(%arg9 : memref<128x512xbf16, #tpu.memory_space<vmem>>) target_semaphore(%arg10 : memref<!tpu.dma_semaphore, #tpu.memory_space<semaphore_mem>>)
      %cst_16 = arith.constant 0.000000e+00 : f32
      %37 = vector.broadcast %cst_16 : f32 to vector<4x128xf32>
      %c0_17 = arith.constant 0 : index
      %c0_18 = arith.constant 0 : index
      %38 = vector.load %arg7[%c0_17, %c0_18] : memref<4x128xf32, #tpu.memory_space<vmem>>, vector<4x128xf32>
      tpu.vector_store %arg7[%c0_17, %c0_18], %37 {strides = array<i32>} : memref<4x128xf32, #tpu.memory_space<vmem>>, vector<4x128xf32>,
      %cst_19 = arith.constant 0.000000e+00 : f32
      %39 = vector.broadcast %cst_19 : f32 to vector<4x128xf32>
      %c0_20 = arith.constant 0 : index
      %c0_21 = arith.constant 0 : index
      %40 = vector.load %arg8[%c0_20, %c0_21] : memref<4x128xf32, #tpu.memory_space<vmem>>, vector<4x128xf32>
      tpu.vector_store %arg8[%c0_20, %c0_21], %39 {strides = array<i32>} : memref<4x128xf32, #tpu.memory_space<vmem>>, vector<4x128xf32>,
      tpu.wait_dma2 semaphore(%arg10 : memref<!tpu.dma_semaphore, #tpu.memory_space<semaphore_mem>>) src(%arg2 : memref<128x512xbf16, #tpu.memory_space<any>>) dst(%arg9 : memref<128x512xbf16, #tpu.memory_space<vmem>>)
    } else {
    }
    %c0 = arith.constant 0 : index
    %c0_1 = arith.constant 0 : index
    %c0_2 = arith.constant 0 : index
    %3 = vector.load %arg1[%c0, %c0_1, %c0_2] : memref<1x4x512xf32, #tpu.memory_space<vmem>>, vector<1x4x512xf32>
    %4 = vector.shape_cast %3 : vector<1x4x512xf32> to vector<4x512xf32>
    %c0_3 = arith.constant 0 : index
    %c0_4 = arith.constant 0 : index
    %5 = vector.load %arg7[%c0_3, %c0_4] : memref<4x128xf32, #tpu.memory_space<vmem>>, vector<4x128xf32>
    %6 = arith.truncf %5 : vector<4x128xf32> to vector<4x128xbf16>
    %c0_5 = arith.constant 0 : index
    %c0_6 = arith.constant 0 : index
    %7 = vector.load %arg9[%c0_5, %c0_6] : memref<128x512xbf16, #tpu.memory_space<vmem>>, vector<128x512xbf16>
    %cst = arith.constant dense<0.000000e+00> : vector<4x512xf32>
    %8 = tpu.matmul %6, %7, %cst {dimension_numbers = #tpu.dot_dimension_numbers<[1], [0], [0], [1], [0, 0, 1, 1], [], []>} : vector<4x128xbf16>, vector<128x512xbf16>, vector<4x512xf32> -> vector<4x512xf32>
    %9 = arith.addf %4, %8 : vector<4x512xf32>
    %10 = vector.extract_strided_slice %9 {offsets = [0, 0], sizes = [4, 256], strides = [1, 1]} : vector<4x512xf32> to vector<4x256xf32>
    %11 = arith.negf %10 : vector<4x256xf32>
    %12 = math.exp %11 : vector<4x256xf32>
    %cst_7 = arith.constant 1.000000e+00 : f32
    %13 = vector.broadcast %cst_7 : f32 to vector<4x256xf32>
    %14 = arith.addf %13, %12 : vector<4x256xf32>
    %15 = arith.divf %13, %14 : vector<4x256xf32>
    %16 = vector.extract_strided_slice %9 {offsets = [0, 256], sizes = [4, 128], strides = [1, 1]} : vector<4x512xf32> to vector<4x128xf32>
    %17 = math.tanh %16 : vector<4x128xf32>
    %18 = vector.extract_strided_slice %9 {offsets = [0, 384], sizes = [4, 128], strides = [1, 1]} : vector<4x512xf32> to vector<4x128xf32>
    %19 = arith.negf %18 : vector<4x128xf32>
    %20 = math.exp %19 : vector<4x128xf32>
    %cst_8 = arith.constant 1.000000e+00 : f32
    %21 = vector.broadcast %cst_8 : f32 to vector<4x128xf32>
    %22 = arith.addf %21, %20 : vector<4x128xf32>
    %23 = arith.divf %21, %22 : vector<4x128xf32>
    %24 = vector.extract_strided_slice %15 {offsets = [0, 128], sizes = [4, 128], strides = [1, 1]} : vector<4x256xf32> to vector<4x128xf32>
    %c0_9 = arith.constant 0 : index
    %c0_10 = arith.constant 0 : index
    %25 = vector.load %arg8[%c0_9, %c0_10] : memref<4x128xf32, #tpu.memory_space<vmem>>, vector<4x128xf32>
    %26 = arith.mulf %24, %25 : vector<4x128xf32>
    %27 = vector.extract_strided_slice %15 {offsets = [0, 0], sizes = [4, 128], strides = [1, 1]} : vector<4x256xf32> to vector<4x128xf32>
    %28 = arith.mulf %27, %17 : vector<4x128xf32>
    %29 = arith.addf %26, %28 : vector<4x128xf32>
    %30 = math.tanh %29 : vector<4x128xf32>
    %31 = arith.mulf %23, %30 : vector<4x128xf32>
    %c0_11 = arith.constant 0 : index
    %c0_12 = arith.constant 0 : index
    %32 = vector.load %arg8[%c0_11, %c0_12] : memref<4x128xf32, #tpu.memory_space<vmem>>, vector<4x128xf32>
    tpu.vector_store %arg8[%c0_11, %c0_12], %29 {strides = array<i32>} : memref<4x128xf32, #tpu.memory_space<vmem>>, vector<4x128xf32>,
    %c0_13 = arith.constant 0 : index
    %c0_14 = arith.constant 0 : index
    %33 = vector.load %arg7[%c0_13, %c0_14] : memref<4x128xf32, #tpu.memory_space<vmem>>, vector<4x128xf32>
    tpu.vector_store %arg7[%c0_13, %c0_14], %31 {strides = array<i32>} : memref<4x128xf32, #tpu.memory_space<vmem>>, vector<4x128xf32>,
    %c5_i32 = arith.constant 5 : i32
    %34 = arith.cmpi eq, %arg0, %c5_i32 : i32
    %35 = arith.extui %34 : i1 to i32
    %c0_i32_15 = arith.constant 0 : i32
    %36 = arith.cmpi ne, %35, %c0_i32_15 : i32
    scf.if %36 {
      %c0_16 = arith.constant 0 : index
      %c0_17 = arith.constant 0 : index
      %37 = vector.load %arg7[%c0_16, %c0_17] : memref<4x128xf32, #tpu.memory_space<vmem>>, vector<2x128xf32>
      %c2 = arith.constant 2 : index
      %c0_18 = arith.constant 0 : index
      %38 = vector.load %arg7[%c2, %c0_18] : memref<4x128xf32, #tpu.memory_space<vmem>>, vector<2x128xf32>
      %39 = tpu.concatenate %37, %38 in 1 : vector<2x128xf32>, vector<2x128xf32> -> vector<2x256xf32>
      %c0_19 = arith.constant 0 : index
      %c0_20 = arith.constant 0 : index
      %40 = vector.load %arg5[%c0_19, %c0_20] : memref<2x256xf32, #tpu.memory_space<vmem>>, vector<2x256xf32>
      tpu.vector_store %arg5[%c0_19, %c0_20], %39 {strides = array<i32>} : memref<2x256xf32, #tpu.memory_space<vmem>>, vector<2x256xf32>,
      %41 = arith.truncf %39 : vector<2x256xf32> to vector<2x256xbf16>
      %c0_21 = arith.constant 0 : index
      %c0_22 = arith.constant 0 : index
      %42 = vector.load %arg3[%c0_21, %c0_22] : memref<256x8xbf16, #tpu.memory_space<vmem>>, vector<256x8xbf16>
      %cst_23 = arith.constant dense<0.000000e+00> : vector<2x8xf32>
      %43 = tpu.matmul %41, %42, %cst_23 {dimension_numbers = #tpu.dot_dimension_numbers<[1], [0], [0], [1], [0, 0, 1, 1], [], []>} : vector<2x256xbf16>, vector<256x8xbf16>, vector<2x8xf32> -> vector<2x8xf32>
      %c0_24 = arith.constant 0 : index
      %c0_25 = arith.constant 0 : index
      %44 = vector.load %arg4[%c0_24, %c0_25] : memref<1x8xf32, #tpu.memory_space<vmem>>, vector<1x8xf32>
      %45 = vector.broadcast %44 : vector<1x8xf32> to vector<2x8xf32>
      %46 = arith.addf %43, %45 : vector<2x8xf32>
      %c0_26 = arith.constant 0 : index
      %c0_27 = arith.constant 0 : index
      %47 = vector.load %arg6[%c0_26, %c0_27] : memref<2x8xf32, #tpu.memory_space<vmem>>, vector<2x8xf32>
      tpu.vector_store %arg6[%c0_26, %c0_27], %46 {strides = array<i32>} : memref<2x8xf32, #tpu.memory_space<vmem>>, vector<2x8xf32>,
    } else {
    }
    return
  }
  func.func @transform_0(%arg0: i32) -> (i32, i32, i32) {
    %c0_i32 = arith.constant 0 : i32
    %c0_i32_0 = arith.constant 0 : i32
    %c0_i32_1 = arith.constant 0 : i32
    return %arg0, %c0_i32, %c0_i32_0 : i32, i32, i32
  }
  func.func @transform_2(%arg0: i32) -> (i32, i32) {
    %c0_i32 = arith.constant 0 : i32
    %c0_i32_0 = arith.constant 0 : i32
    %c0_i32_1 = arith.constant 0 : i32
    return %c0_i32, %c0_i32_0 : i32, i32
  }
  func.func @transform_3(%arg0: i32) -> (i32, i32) {
    %c0_i32 = arith.constant 0 : i32
    %c0_i32_0 = arith.constant 0 : i32
    %c0_i32_1 = arith.constant 0 : i32
    return %c0_i32, %c0_i32_0 : i32, i32
  }
  func.func @transform_4(%arg0: i32) -> (i32, i32) {
    %c0_i32 = arith.constant 0 : i32
    %c0_i32_0 = arith.constant 0 : i32
    %c0_i32_1 = arith.constant 0 : i32
    return %c0_i32, %c0_i32_0 : i32, i32
  }
  func.func @transform_5(%arg0: i32) -> (i32, i32) {
    %c0_i32 = arith.constant 0 : i32
    %c0_i32_0 = arith.constant 0 : i32
    %c0_i32_1 = arith.constant 0 : i32
    return %c0_i32, %c0_i32_0 : i32, i32
  }
}

</mosaic_0001>

<bundles_post_ra>
// kernel: pctdm_forward.5
= control target key start
LH: loop header
LB: loop body
LE: loop exit
PB: predicated region body
PF: predicated region fallthrough
CT: control target
= control target key end

     0   :  { %8 = vsyncpa [#allocation4], 0  ;;  %s1617_s0 = inlined_call_operand.vmem [shape: bf16[24,256], index: 0, kind: input, shape index: {}]   ;;  %s1618_s1 = inlined_call_operand.hbm [shape: bf16[256,1024], index: 1, kind: input, shape index: {}]   ;;  %s1619_s2 = inlined_call_operand.vmem [shape: f32[1,1024], index: 2, kind: input, shape index: {}]   ;;  %s1620_s3 = inlined_call_operand.vmem [shape: f32[24,1024], index: 3, kind: output, shape index: {}]  }
   0x1   :  { %10 = vsyncpa [#allocation4 + $0x1], 0  ;;  %s1404_s12 = smov 0   ;;  %s1406_s13 = smov 0  }
   0x2   :  { %s1408_s14 = smov 0   ;;  %s1410_s15 = smov 0  }
   0x3   :  { %s1412_s16 = smov 0   ;;  %s1414_s17 = smov 0  }
   0x4 LB: > { %s1055_s18 = sadd.s32 4294967295, %s1378_s17   ;;  %s31_s19 = sadd.s32 1, %s1374_s16  ;;  %s1378_s17 = sphi %s1414_s17, %s16_s17   ;;  %s1374_s16 = sphi %s1412_s16, %s1629_s16   ;;  %s1370_s15 = sphi %s1410_s15, %s1628_s15   ;;  %s1366_s14 = sphi %s1408_s14, %s1627_s14   ;;  %s1362_s13 = sphi %s1406_s13, %s1626_s13   ;;  %s1358_s12 = sphi %s1404_s12, %s1625_s12  }
   0x5   : > { %p33_p0 = scmp.ge.s32.totalorder %s31_s19, 2  ;;  %s72_s20 = sadd.s32 1, %s1366_s14 }
   0x6   : > { %p79_p1 = scmp.ne.s32.totalorder %s1366_s14, %s1362_s13  ;;  %p80_p2 = scmp.eq.s32.totalorder %s1378_s17, 0 }
   0x7   : > { %s1631_s19 = smov (%p33_p0, %s31_s19), 0  ;;  %p85_p4 = scmp.ne.s32.totalorder %s1362_s13, %s1358_s12 }
   0x8   : > { %p1440_p3 = por %p80_p2, %p79_p1  ;;  %s68_s22 = ssub.s32 %s1374_s16, %s1631_s19 }
   0x9   : > { %p86_p5 = scmp.eq.s32.totalorder %s1055_s18, 0  ;;  %p70_p6 = scmp.eq.s32.totalorder %s68_s22, 0 }
   0xa   : > { %p137_p7 = scmp.eq.s32.totalorder %s1055_s18, 1  ;;  %p1147_p10 = scmp.lt.s32.totalorder %s1378_s17, 2 }
   0xb   : > { %p1447_p8 = por %p86_p5, %p85_p4  ;;  %s178_s26 = sand.u32 1, %s1366_s14  }
   0xc   : > { %s1452_s24 = scalar_select %p70_p6, %s1366_s14, %s72_s20  }
   0xd   : > { %p1454_p9 = por %p137_p7, %p79_p1  ;;  %s1138_s27 = sshll.u32 %s1374_s16, 8 }
   0xe   : > { %s1060_s28 = sshll.u32 %s178_s26, 9  ;;  %s191_s4 = scalar_lea.hbm %s1618_s1, %s1138_s27 }
   0xf   : > { %s182_s5 = scalar_lea.vmem [#allocation3], %s1060_s28  ;;  %p1466_p11 = pnand %p1147_p10, %p1440_p3 }
  0x10   : > { %s192_s6 = sshll.u32 %s182_s5, 4  ;;  %p1063_p12 = scmp.ge.s32.totalorder %s1378_s17, 1  ;;  %s193_s6 = int_to_ptr.vmem [resolvable:$true] %s192_s6 }
  0x11   : > { %s179_s8 = scalar_lea.sflag [#allocation4], %s178_s26  ;;  %p1302_p13 = pneg %p1466_p11 }
  0x12   : > { %s1313_s9 = scalar_lea.vmem %s193_s6, 8192  ;;  %s1380_s10 = smov [#allocation3]  }
  0x13   : > { %p1314_p0 = scmp.ne.s32.totalorder %s193_s6, %s1313_s9  ;;  %s1318_s11 = sshll.u32 %s1380_s10, 4  ;;  %s1319_s11 = int_to_ptr.vmem [resolvable:$false] %s1318_s11 }
  0x14   : > { %s1320_s12 = scalar_lea.vmem %s1319_s11, 16384  ;;  %p1321_p4 = scmp.lt.s32.totalorder %s193_s6, %s1319_s11 }
  0x15   : > { %p1316_p1 = pnand %p1314_p0, %p1302_p13  ;;  %p1322_p5 = scmp.lt.s32.totalorder %s1320_s12, %s1313_s9 }
  0x17   : > { %p1317_p2 = pneg %p1316_p1  ;;  %p1323_p3 = por %p1322_p5, %p1321_p4 }
  0x19   : > { %p1324_p6 = pnand %p1323_p3, %p1317_p2 }
  0x1b   : > { %1327 = shalt.err (!%p1324_p6)
}
  0x1c   : > { %s1381_s18 = smov 512   ;;  %s1382_s20 = smov 256  }
  0x1d   : > { %s1383_s21 = smov 16   ;;  %p208_p7 = scmp.lt.s32.totalorder %s1378_s17, 3 }
  0x1e   : > { %1146 = dma.hbm_to_vmem [thread:$0]  (!%p1466_p11), %s191_s4, 8192, %s193_s6, %s179_s8, %s1381_s18, %s1382_s20, %s1383_s21  }
  0x1f   : > { %p209_p10 = pnand %p1063_p12, %p208_p7 }
  0x20   : > { %s1479_s22 = sand.u32 (!%p209_p10), 1, %s1362_s13  }
  0x21   : > { %212 = sbr.rel (%p209_p10) target bundleno = 318 (0x13e), region = 32  ;;  %s1064_s26 = sshll.u32 (!%p209_p10), %s1479_s22, 9 }
  0x22   : > { %s215_s27 = scalar_lea.sflag (!%p209_p10), [#allocation4], %s1479_s22  ;;  %s1483_s28 = scalar_lea.vmem (!%p209_p10), [#allocation3], %s1064_s26 }
  0x26   : > { %1353 = dma.done.wait (%p1447_p8), %s215_s27, 8192  }
  0x27   : > { %1355 = vsyncadd (%p1447_p8), %s215_s27, 4294959104  ;;  %v1199_v0 = vld [vmem:[%s1483_s28 + $0xe4] ss:$16 sps:$4 sm:$0xff]   ;;  %v1201_v1 = vld [vmem:[%s1483_s28 + $0xec] ss:$16 sps:$4 sm:$0xff]   ;;  %s1065_s7 = sshll.u32 %s1370_s15, 2 }
  0x28   : > { %707 = vmatprep.subr.bf16.mxu0 %v1199_v0  ;;  %v1203_v2 = vld [vmem:[%s1483_s28 + $0xe0] ss:$16 sps:$4 sm:$0xff]   ;;  %v1204_v3 = vld [vmem:[%s1483_s28 + $0xe8] ss:$16 sps:$4 sm:$0xff]   ;;  %758 = vmatprep.subr.bf16.mxu1 %v1201_v1  ;;  %v1205_v4 = vld [vmem:[%s1483_s28 + $0xc4] ss:$16 sps:$4 sm:$0xff]  }
  0x29   : > { %708 = vmatpush1.bf16.msra.mxu0 %v1203_v2  ;;  %759 = vmatpush1.bf16.msra.mxu1 %v1204_v3  ;;  %v1207_v5 = vld [vmem:[%s1483_s28 + $0xcc] ss:$16 sps:$4 sm:$0xff]   ;;  %v1209_v6 = vld [vmem:[%s1483_s28 + $0xc0] ss:$16 sps:$4 sm:$0xff]   ;;  %v1210_v7 = vld [vmem:[%s1483_s28 + $0xc8] ss:$16 sps:$4 sm:$0xff]  }
  0x2a   : > { %709 = vmatprep.subr.bf16.mxu0 %v1205_v4  ;;  %760 = vmatprep.subr.bf16.mxu1 %v1207_v5  ;;  %v1211_v8 = vld [vmem:[%s1483_s28 + $0xa4] ss:$16 sps:$4 sm:$0xff]   ;;  %v1213_v9 = vld [vmem:[%s1483_s28 + $0xac] ss:$16 sps:$4 sm:$0xff]   ;;  %v1215_v10 = vld [vmem:[%s1483_s28 + $0xa0] ss:$16 sps:$4 sm:$0xff]   ;;  %v850_v5 = vlaneseq }
  0x2b   : > { %v1216_v11 = vld [vmem:[%s1483_s28 + $0xa8] ss:$16 sps:$4 sm:$0xff]   ;;  %v1217_v12 = vld [vmem:[%s1483_s28 + $0x84] ss:$16 sps:$4 sm:$0xff]   ;;  %v1219_v13 = vld [vmem:[%s1483_s28 + $0x8c] ss:$16 sps:$4 sm:$0xff]  }
  0x2c   : > { %v1221_v14 = vld [vmem:[%s1483_s28 + $0x80] ss:$16 sps:$4 sm:$0xff]   ;;  %v1222_v15 = vld [vmem:[%s1483_s28 + $0x88] ss:$16 sps:$4 sm:$0xff]   ;;  %v1223_v16 = vld [vmem:[%s1483_s28 + $0x64] ss:$16 sps:$4 sm:$0xff]  }
  0x2d   : > { %710 = vmatpush1.bf16.msra.mxu0 %v1209_v6  ;;  %761 = vmatpush1.bf16.msra.mxu1 %v1210_v7  ;;  %v1225_v17 = vld [vmem:[%s1483_s28 + $0x6c] ss:$16 sps:$4 sm:$0xff]   ;;  %v1227_v18 = vld [vmem:[%s1483_s28 + $0x60] ss:$16 sps:$4 sm:$0xff]   ;;  %v1228_v19 = vld [vmem:[%s1483_s28 + $0x68] ss:$16 sps:$4 sm:$0xff]  }
  0x2e   : > { %711 = vmatprep.subr.bf16.mxu0 %v1211_v8  ;;  %762 = vmatprep.subr.bf16.mxu1 %v1213_v9  ;;  %v1229_v20 = vld [vmem:[%s1483_s28 + $0x44] ss:$16 sps:$4 sm:$0xff]   ;;  %v1231_v21 = vld [vmem:[%s1483_s28 + $0x4c] ss:$16 sps:$4 sm:$0xff]   ;;  %v1233_v22 = vld [vmem:[%s1483_s28 + $0x40] ss:$16 sps:$4 sm:$0xff]  }
  0x2f   : > { %v1234_v23 = vld [vmem:[%s1483_s28 + $0x48] ss:$16 sps:$4 sm:$0xff]   ;;  %v1235_v24 = vld [vmem:[%s1483_s28 + $0x24] ss:$16 sps:$4 sm:$0xff]   ;;  %v1237_v25 = vld [vmem:[%s1483_s28 + $0x2c] ss:$16 sps:$4 sm:$0xff]  }
  0x30   : > { %v1239_v26 = vld [vmem:[%s1483_s28 + $0x20] ss:$16 sps:$4 sm:$0xff]   ;;  %v1240_v27 = vld [vmem:[%s1483_s28 + $0x28] ss:$16 sps:$4 sm:$0xff]   ;;  %v1241_v28 = vld [vmem:[%s1483_s28 + $0x4] ss:$16 sps:$4 sm:$0xff]  }
  0x31   : > { %712 = vmatpush1.bf16.msra.mxu0 %v1215_v10  ;;  %763 = vmatpush1.bf16.msra.mxu1 %v1216_v11  ;;  %v1243_v29 = vld [vmem:[%s1483_s28 + $0xc] ss:$16 sps:$4 sm:$0xff]   ;;  %v1245_v30 = vld [vmem:[%s1483_s28] ss:$16 sps:$4 sm:$0xff]   ;;  %v1246_v31 = vld [vmem:[%s1483_s28 + $0x8] ss:$16 sps:$4 sm:$0xff]  }
  0x32   : > { %713 = vmatprep.subr.bf16.mxu0 %v1217_v12  ;;  %764 = vmatprep.subr.bf16.mxu1 %v1219_v13  ;;  %v1247_v32 = vld [vmem:[%s1483_s28 + $0x1e4] ss:$16 sps:$4 sm:$0xff]   ;;  %v1249_v33 = vld [vmem:[%s1483_s28 + $0x1ec] ss:$16 sps:$4 sm:$0xff]   ;;  %v1251_v34 = vld [vmem:[%s1483_s28 + $0x1e0] ss:$16 sps:$4 sm:$0xff]  }
  0x33   : > { %v1252_v35 = vld [vmem:[%s1483_s28 + $0x1e8] ss:$16 sps:$4 sm:$0xff]   ;;  %v1253_v36 = vld [vmem:[%s1483_s28 + $0x1c4] ss:$16 sps:$4 sm:$0xff]   ;;  %v1255_v37 = vld [vmem:[%s1483_s28 + $0x1cc] ss:$16 sps:$4 sm:$0xff]  }
  0x34   : > { %v1257_v38 = vld [vmem:[%s1483_s28 + $0x1c0] ss:$16 sps:$4 sm:$0xff]   ;;  %v1258_v39 = vld [vmem:[%s1483_s28 + $0x1c8] ss:$16 sps:$4 sm:$0xff]   ;;  %v1259_v40 = vld [vmem:[%s1483_s28 + $0x1a4] ss:$16 sps:$4 sm:$0xff]  }
  0x35   : > { %714 = vmatpush1.bf16.msra.mxu0 %v1221_v14  ;;  %765 = vmatpush1.bf16.msra.mxu1 %v1222_v15  ;;  %v1261_v41 = vld [vmem:[%s1483_s28 + $0x1ac] ss:$16 sps:$4 sm:$0xff]   ;;  %v1263_v42 = vld [vmem:[%s1483_s28 + $0x1a0] ss:$16 sps:$4 sm:$0xff]   ;;  %v1264_v43 = vld [vmem:[%s1483_s28 + $0x1a8] ss:$16 sps:$4 sm:$0xff]  }
  0x36   : > { %715 = vmatprep.subr.bf16.mxu0 %v1223_v16  ;;  %766 = vmatprep.subr.bf16.mxu1 %v1225_v17  ;;  %v1265_v44 = vld [vmem:[%s1483_s28 + $0x184] ss:$16 sps:$4 sm:$0xff]   ;;  %v1267_v45 = vld [vmem:[%s1483_s28 + $0x18c] ss:$16 sps:$4 sm:$0xff]   ;;  %v1269_v47 = vld [vmem:[%s1483_s28 + $0x180] ss:$16 sps:$4 sm:$0xff]  }
  0x37   : > { %v1297_v46 = vld [vmem:[%s1617_s0 + $0x4] ss:$8 sps:$4 sm:$0xff]   ;;  %v1270_v48 = vld [vmem:[%s1483_s28 + $0x188] ss:$16 sps:$4 sm:$0xff]   ;;  %v1275_v51 = vld [vmem:[%s1483_s28 + $0x160] ss:$16 sps:$4 sm:$0xff]  }
  0x38   : > { %v1271_v49 = vld [vmem:[%s1483_s28 + $0x164] ss:$16 sps:$4 sm:$0xff]   ;;  %v1273_v50 = vld [vmem:[%s1483_s28 + $0x16c] ss:$16 sps:$4 sm:$0xff]   ;;  %739 = vmatprep.mubr.bf16.mxu0 %v1297_v46  ;;  %790 = vmatprep.mubr.bf16.mxu1 %v1297_v46  ;;  %v1276_v52 = vld [vmem:[%s1483_s28 + $0x168] ss:$16 sps:$4 sm:$0xff]  }
  0x39   : > { %716 = vmatpush1.bf16.msra.mxu0 %v1227_v18  ;;  %767 = vmatpush1.bf16.msra.mxu1 %v1228_v19  ;;  %v1277_v53 = vld [vmem:[%s1483_s28 + $0x144] ss:$16 sps:$4 sm:$0xff]   ;;  %v1279_v54 = vld [vmem:[%s1483_s28 + $0x14c] ss:$16 sps:$4 sm:$0xff]   ;;  %v1281_v55 = vld [vmem:[%s1483_s28 + $0x140] ss:$16 sps:$4 sm:$0xff]  }
  0x3a   : > { %717 = vmatprep.subr.bf16.mxu0 %v1229_v20  ;;  %768 = vmatprep.subr.bf16.mxu1 %v1231_v21  ;;  %v1282_v56 = vld [vmem:[%s1483_s28 + $0x148] ss:$16 sps:$4 sm:$0xff]   ;;  %v1283_v57 = vld [vmem:[%s1483_s28 + $0x124] ss:$16 sps:$4 sm:$0xff]   ;;  %v1285_v58 = vld [vmem:[%s1483_s28 + $0x12c] ss:$16 sps:$4 sm:$0xff]  }
  0x3b   : > { %v1287_v59 = vld [vmem:[%s1483_s28 + $0x120] ss:$16 sps:$4 sm:$0xff]   ;;  %v1288_v60 = vld [vmem:[%s1483_s28 + $0x128] ss:$16 sps:$4 sm:$0xff]   ;;  %v1289_v61 = vld [vmem:[%s1483_s28 + $0x104] ss:$16 sps:$4 sm:$0xff]  }
  0x3c   : > { %v1291_v62 = vld [vmem:[%s1483_s28 + $0x10c] ss:$16 sps:$4 sm:$0xff]   ;;  %v1293_v63 = vld [vmem:[%s1483_s28 + $0x100] ss:$16 sps:$4 sm:$0xff]   ;;  %v1294_v0 = vld [vmem:[%s1483_s28 + $0x108] ss:$16 sps:$4 sm:$0xff]  }
  0x3d   : > { %718 = vmatpush1.bf16.msra.mxu0 %v1233_v22  ;;  %769 = vmatpush1.bf16.msra.mxu1 %v1234_v23  ;;  %v305_v1 = vld [vmem:[%s1617_s0 + $0x10] sm:$0xff]  ;;  %v1295_v2 = vld [vmem:[%s1617_s0] ss:$8 sps:$4 sm:$0xff]   ;;  %p269_p8 = scmp.lt.s32.totalorder %s1065_s7, 7  ;;  %v851_v6 = vshrl.u32 %v850_v5, 7  ;;  %s1140_s11 = smul.u32 96, %s1479_s22 }
  0x3e   : > { %719 = vmatprep.subr.bf16.mxu0 %v1235_v24  ;;  %770 = vmatprep.subr.bf16.mxu1 %v1237_v25  ;;  %v1069_v3 = vcombine.high %v305_v1, %v305_v1  ;;  %v1068_v4 = vcombine.low %v305_v1, %v305_v1  ;;  %s1139_s18 = sshll.u32 (%p1454_p9), %s1370_s15, 5 }
  0x3f   : > { %s1633_s7 = smov (!%p269_p8, %s1065_s7), 7  ;;  %v852_v7 = vsub.s32 0, %v851_v6  ;;  %v860_v8 = vsub.s32 2, %v851_v6  ;;  %v856_v10 = vsub.s32 1, %v851_v6  ;;  %v864_v11 = vsub.s32 3, %v851_v6  ;;  %s1567_s12 = scalar_lea.vmem [#allocation5], %s1140_s11 }
  0x40   : > { %s271_s10 = scalar_lea.vmem %s1619_s2, %s1633_s7  ;;  %s906_s22 = scalar_lea.vmem (%p1454_p9), %s1620_s3, %s1139_s18 }
  0x41   : > { %720 = vmatpush1.bf16.msra.mxu0 %v1239_v26  ;;  %771 = vmatpush1.bf16.msra.mxu1 %v1240_v27  ;;  %v848_v9 = vld [vmem:[%s271_s10] sm:$0xf] }
  0x42   : > { %721 = vmatprep.subr.bf16.mxu0 %v1241_v28  ;;  %772 = vmatprep.subr.bf16.mxu1 %v1243_v29  ;;  %v853_v12 = vrot.slane %v848_v9, %v852_v7  ;;  %v861_v13 = vrot.slane %v848_v9, %v860_v8  ;;  %v857_v14 = vrot.slane %v848_v9, %v856_v10 }
  0x43   : > { %v865_v15 = vrot.slane %v848_v9, %v864_v11 }
  0x45   : > { %722 = vmatpush1.bf16.msra.mxu0 %v1245_v30  ;;  %773 = vmatpush1.bf16.msra.mxu1 %v1246_v31 }
  0x46   : > { %723 = vmatprep.subr.bf16.mxu0 %v1247_v32  ;;  %774 = vmatprep.subr.bf16.mxu1 %v1249_v33 }
  0x49   : > { %724 = vmatpush2.bf16.msra.mxu0 %v1251_v34  ;;  %775 = vmatpush2.bf16.msra.mxu1 %v1252_v35 }
  0x4a   : > { %725 = vmatprep.subr.bf16.mxu0 %v1253_v36  ;;  %776 = vmatprep.subr.bf16.mxu1 %v1255_v37 }
  0x4d   : > { %726 = vmatpush2.bf16.msra.mxu0 %v1257_v38  ;;  %777 = vmatpush2.bf16.msra.mxu1 %v1258_v39 }
  0x4e   : > { %727 = vmatprep.subr.bf16.mxu0 %v1259_v40  ;;  %778 = vmatprep.subr.bf16.mxu1 %v1261_v41 }
  0x51   : > { %728 = vmatpush2.bf16.msra.mxu0 %v1263_v42  ;;  %779 = vmatpush2.bf16.msra.mxu1 %v1264_v43 }
  0x52   : > { %729 = vmatprep.subr.bf16.mxu0 %v1265_v44  ;;  %780 = vmatprep.subr.bf16.mxu1 %v1267_v45 }
  0x55   : > { %730 = vmatpush2.bf16.msra.mxu0 %v1269_v47  ;;  %781 = vmatpush2.bf16.msra.mxu1 %v1270_v48 }
  0x56   : > { %731 = vmatprep.subr.bf16.mxu0 %v1271_v49  ;;  %782 = vmatprep.subr.bf16.mxu1 %v1273_v50 }
  0x59   : > { %732 = vmatpush2.bf16.msra.mxu0 %v1275_v51  ;;  %783 = vmatpush2.bf16.msra.mxu1 %v1276_v52 }
  0x5a   : > { %733 = vmatprep.subr.bf16.mxu0 %v1277_v53  ;;  %784 = vmatprep.subr.bf16.mxu1 %v1279_v54 }
  0x5d   : > { %734 = vmatpush2.bf16.msra.mxu0 %v1281_v55  ;;  %785 = vmatpush2.bf16.msra.mxu1 %v1282_v56 }
  0x5e   : > { %735 = vmatprep.subr.bf16.mxu0 %v1283_v57  ;;  %786 = vmatprep.subr.bf16.mxu1 %v1285_v58 }
  0x61   : > { %736 = vmatpush2.bf16.msra.mxu0 %v1287_v59  ;;  %787 = vmatpush2.bf16.msra.mxu1 %v1288_v60 }
  0x62   : > { %737 = vmatprep.subr.bf16.mxu0 %v1289_v61  ;;  %788 = vmatprep.subr.bf16.mxu1 %v1291_v62 }
  0x65   : > { %738 = vmatpush2.bf16.msra.mxu0 %v1293_v63  ;;  %789 = vmatpush2.bf16.msra.mxu1 %v1294_v0 }
  0x68   : > { %740 = vmatmul.mubr.bf16.vlgmr.msra.gmra.mxu0 %v1295_v2  ;;  %791 = vmatmul.mubr.bf16.vlgmr.msra.gmra.mxu1 %v1295_v2 }
  0x69   : > { %749 = vmatprep.mubr.bf16.mxu0 %v1069_v3  ;;  %800 = vmatprep.mubr.bf16.mxu1 %v1069_v3 }
  0x70   : > { %750 = vmatmul.mubr.bf16.gmra.mxu0 %v1068_v4  ;;  %801 = vmatmul.mubr.bf16.gmra.mxu1 %v1068_v4 }
 0x128   : > { %v741_v16 = vpop.f32.mrf.mxu0  ;;  %v792_v17 = vpop.f32.mrf.mxu1 }
 0x129   : > { %v870_v18 = vadd.f32 %v853_v12, %v741_v16  ;;  %v872_v19 = vadd.f32 %v861_v13, %v792_v17 }
 0x12a   : > { %v743_v20 = vpop.f32.mrf.mxu0  ;;  %v794_v21 = vpop.f32.mrf.mxu1 }
 0x12b   : > { %882 = vst [vmem:[%s1567_s12] sm:$0xff] %v870_v18  ;;  %884 = vst [vmem:[%s1567_s12 + $0x10] sm:$0xff] %v872_v19  ;;  %v871_v22 = vadd.f32 %v857_v14, %v743_v20  ;;  %v873_v23 = vadd.f32 %v865_v15, %v794_v21 }
 0x12c   : > { %v745_v24 = vpop.f32.mrf.mxu0  ;;  %v796_v25 = vpop.f32.mrf.mxu1 }
 0x12d   : > { %883 = vst [vmem:[%s1567_s12 + $0x8] sm:$0xff] %v871_v22  ;;  %885 = vst [vmem:[%s1567_s12 + $0x18] sm:$0xff] %v873_v23  ;;  %v874_v26 = vadd.f32 %v853_v12, %v745_v24  ;;  %v876_v27 = vadd.f32 %v861_v13, %v796_v25 }
 0x12e   : > { %v747_v28 = vpop.f32.mrf.mxu0  ;;  %v798_v29 = vpop.f32.mrf.mxu1 }
 0x12f   : > { %886 = vst [vmem:[%s1567_s12 + $0x20] sm:$0xff] %v874_v26  ;;  %888 = vst [vmem:[%s1567_s12 + $0x30] sm:$0xff] %v876_v27  ;;  %v875_v30 = vadd.f32 %v857_v14, %v747_v28  ;;  %v877_v31 = vadd.f32 %v865_v15, %v798_v29 }
 0x130   : > { %v751_v32 = vpop.f32.mrf.mxu0  ;;  %v802_v33 = vpop.f32.mrf.mxu1 }
 0x131   : > { %887 = vst [vmem:[%s1567_s12 + $0x28] sm:$0xff] %v875_v30  ;;  %889 = vst [vmem:[%s1567_s12 + $0x38] sm:$0xff] %v877_v31  ;;  %v878_v34 = vadd.f32 %v853_v12, %v751_v32  ;;  %v880_v35 = vadd.f32 %v861_v13, %v802_v33 }
 0x132   : > { %v753_v36 = vpop.f32.mrf.mxu0  ;;  %v804_v37 = vpop.f32.mrf.mxu1  ;;  %900 = sbr.rel (!%p1454_p9) target bundleno = 318 (0x13e), region = 48  ;;  %v919_v44 = vld [vmem:[%s1567_s12] sm:$0xff] (%p1454_p9)  ;;  %v923_v46 = vld [vmem:[%s1567_s12 + $0x10] sm:$0xff] (%p1454_p9) }
 0x133   : > { %890 = vst [vmem:[%s1567_s12 + $0x40] sm:$0xff] %v878_v34  ;;  %892 = vst [vmem:[%s1567_s12 + $0x50] sm:$0xff] %v880_v35  ;;  %v879_v38 = vadd.f32 %v857_v14, %v753_v36  ;;  %v881_v39 = vadd.f32 %v865_v15, %v804_v37 }
 0x134   : > { %v755_v40 = vpop.f32.mrf.mxu0  ;;  %v806_v41 = vpop.f32.mrf.mxu1  ;;  %v921_v45 = vld [vmem:[%s1567_s12 + $0x8] sm:$0xff] (%p1454_p9)  ;;  %v925_v47 = vld [vmem:[%s1567_s12 + $0x18] sm:$0xff] (%p1454_p9)  ;;  %920 = vst [vmem:[%s906_s22] sm:$0xff] (%p1454_p9), %v919_v44  ;;  %924 = vst [vmem:[%s906_s22 + $0x10] sm:$0xff] (%p1454_p9), %v923_v46 }
 0x135   : > { %891 = vst [vmem:[%s1567_s12 + $0x48] sm:$0xff] %v879_v38  ;;  %893 = vst [vmem:[%s1567_s12 + $0x58] sm:$0xff] %v881_v39 }
 0x136   : > { %v756_v42 = vpop.f32.mrf.mxu0  ;;  %v807_v43 = vpop.f32.mrf.mxu1  ;;  %v927_v48 = vld [vmem:[%s1567_s12 + $0x20] sm:$0xff] (%p1454_p9)  ;;  %922 = vst [vmem:[%s906_s22 + $0x8] sm:$0xff] (%p1454_p9), %v921_v45  ;;  %926 = vst [vmem:[%s906_s22 + $0x18] sm:$0xff] (%p1454_p9), %v925_v47  ;;  %v931_v50 = vld [vmem:[%s1567_s12 + $0x30] sm:$0xff] (%p1454_p9) }
 0x137   : > { %928 = vst [vmem:[%s906_s22 + $0x40] sm:$0xff] %v927_v48  ;;  %932 = vst [vmem:[%s906_s22 + $0x50] sm:$0xff] %v931_v50 }
 0x138   : > { %v929_v49 = vld [vmem:[%s1567_s12 + $0x28] sm:$0xff]  ;;  %v933_v51 = vld [vmem:[%s1567_s12 + $0x38] sm:$0xff] }
 0x139   : > { %930 = vst [vmem:[%s906_s22 + $0x48] sm:$0xff] %v929_v49  ;;  %934 = vst [vmem:[%s906_s22 + $0x58] sm:$0xff] %v933_v51 }
 0x13a   : > { %v935_v52 = vld [vmem:[%s1567_s12 + $0x40] sm:$0xff]  ;;  %v939_v54 = vld [vmem:[%s1567_s12 + $0x50] sm:$0xff] }
 0x13b   : > { %936 = vst [vmem:[%s906_s22 + $0x80] sm:$0xff] %v935_v52  ;;  %940 = vst [vmem:[%s906_s22 + $0x90] sm:$0xff] %v939_v54 }
 0x13c   : > { %v937_v53 = vld [vmem:[%s1567_s12 + $0x48] sm:$0xff]  ;;  %v941_v55 = vld [vmem:[%s1567_s12 + $0x58] sm:$0xff] }
 0x13d   : > { %938 = vst [vmem:[%s906_s22 + $0x88] sm:$0xff] %v937_v53  ;;  %942 = vst [vmem:[%s906_s22 + $0x98] sm:$0xff] %v941_v55 }
 0x13e PF: > { %s16_s17 = sadd.s32 1, %s1378_s17   ;;  %s1625_s12 = smov %s1362_s13 }
 0x13f   : > { %p13_p9 = scmp.ge.s32.totalorder %s16_s17, 4   ;;  %s1626_s13 = smov %s1366_s14 }
 0x140   : > { %s1627_s14 = smov %s1452_s24  ;;  %s1628_s15 = smov %s1374_s16 }
 0x141   : > { %s1629_s16 = smov %s1631_s19  ;;  %15 = sbr.rel (!%p13_p9) target bundleno = 4 (0x4), region = 109 }
 0x146   :  { %958 = vsyncpa [#allocation4], 1 }
 0x147   :  { %960 = vsyncpa [#allocation4 + $0x1], 1 }

// kernel: pctdm_forward.7
= control target key start
LH: loop header
LB: loop body
LE: loop exit
PB: predicated region body
PF: predicated region fallthrough
CT: control target
= control target key end

     0   :  { %s519_s17 = smov 0   ;;  %s589_s0 = inlined_call_operand.vmem [shape: f32[12,2,128], index: 0, kind: input, shape index: {}]   ;;  %s590_s1 = inlined_call_operand.vmem [shape: f32[12,2,128], index: 1, kind: input, shape index: {}]   ;;  %s591_s2 = inlined_call_operand.vmem [shape: f32[1,128], index: 2, kind: input, shape index: {}]   ;;  %s592_s3 = inlined_call_operand.<no memory space> [shape: f32[1,1], index: 3, kind: input, shape index: {}]   ;;  %s593_s4 = inlined_call_operand.vmem [shape: f32[2,6,2,128], index: 4, kind: output, shape index: {}]  }
   0x1   :  { %v9_v0 = vstv %s592_s3 }
   0x2   :  { %10 = vst [vmem:[#allocation2] sm:$0x1] %v9_v0 }
   0x3 LB: > { %s525_s18 = sadd.s32 4294967295, %s488_s17   ;;  %p448_p0 = scmp.ge.s32.totalorder %s488_s17, 1  ;;  %s488_s17 = sphi %s519_s17, %s16_s17  }
   0x4   : > { %p176_p1 = scmp.lt.s32.totalorder %s488_s17, 3 }
   0x6   : > { %p177_p2 = pnand %p448_p0, %p176_p1 }
   0x7   : > { %s207_s19 = smul.u32 (!%p177_p2), 6, %s525_s18  ;;  %p219_p4 = scmp.lt.s32.totalorder (!%p177_p2), %s525_s18, 1 }
   0x8   : > { %180 = sbr.rel (%p177_p2) target bundleno = 366 (0x16e), region = 36 }
   0x9   : > { %p208_p3 = scmp.lt.s32.totalorder (!%p177_p2), %s207_s19, 11 }
   0xd   : > { %s595_s19 = smov (!%p208_p3, %s207_s19), 11  ;;  %v452_v1 = vld [vmem:[%s591_s2] ss:$0 sm:$0xff]  ;;  %vm255_vm0 = vcmask 1041408   ;;  %v490_v32 = vmov 0   ;;  %vm287_vm1 = vcmask 1024  }
   0xe   : > { %s449_s3 = sshll.u32 %s595_s19, 1  ;;  %467 = vset.pattern.permute.xlu1 %v490_v32  ;;  %466 = vset.pattern.permute.xlu0 %v490_v32  ;;  %v453_v34 = vld [vmem:[#allocation2] ss:$0 sm:$0xff]  ;;  %s597_s18 = smov (!%p219_p4, %s525_s18), 1 }
   0xf   : > { %s211_s22 = scalar_lea.vmem %s589_s0, %s449_s3  ;;  %s217_s25 = scalar_lea.vmem %s590_s1, %s449_s3 }
  0x10   : > { %v228_v2 = vld [vmem:[%s211_s22 + $0x8] sm:$0x3]  ;;  %v224_v4 = vld [vmem:[%s211_s22] sm:$0x3]  ;;  %v229_v7 = vld [vmem:[%s211_s22 + $0xa] sm:$0x3] }
  0x11   : > { %v234_v3 = vld [vmem:[%s217_s25 + $0x8] sm:$0x3]  ;;  %v230_v6 = vld [vmem:[%s217_s25] sm:$0x3]  ;;  %v235_v8 = vld [vmem:[%s217_s25 + $0xa] sm:$0x3] }
  0x12   : > { %v539_v5 = vmax.f32 %v228_v2, %v234_v3  ;;  %v541_v9 = vmax.f32 %v224_v4, %v230_v6  ;;  %v543_v10 = vmax.f32 %v229_v7, %v235_v8  ;;  %v225_v11 = vld [vmem:[%s211_s22 + $0x2] sm:$0x3]  ;;  %v227_v13 = vld [vmem:[%s211_s22 + $0x6] sm:$0x3]  ;;  %v226_v17 = vld [vmem:[%s211_s22 + $0x4] sm:$0x3] }
  0x13   : > { %v231_v12 = vld [vmem:[%s217_s25 + $0x2] sm:$0x3]  ;;  %v233_v16 = vld [vmem:[%s217_s25 + $0x6] sm:$0x3]  ;;  %v232_v18 = vld [vmem:[%s217_s25 + $0x4] sm:$0x3] }
  0x14   : > { %v253_v14 = vmul.f32 %v452_v1, %v539_v5  ;;  %v546_v15 = vmax.f32 %v225_v11, %v231_v12  ;;  %v249_v19 = vmul.f32 %v452_v1, %v541_v9  ;;  %v254_v20 = vmul.f32 %v452_v1, %v543_v10  ;;  %s456_s28 = smul.u32 12, %s597_s18 }
  0x15   : > { %v550_v21 = vmax.f32 %v227_v13, %v233_v16  ;;  %v552_v22 = vmax.f32 %v226_v17, %v232_v18 }
  0x16   : > { %v268_v23 = vsel %vm255_vm0, %v253_v14, 0.0  ;;  %v250_v24 = vmul.f32 %v452_v1, %v546_v15  ;;  %v256_v25 = vsel %vm255_vm0, %v249_v19, 0.0  ;;  %v271_v26 = vsel %vm255_vm0, %v254_v20, 0.0  ;;  %s223_s5 = scalar_lea.vmem %s593_s4, %s456_s28 }
  0x17   : > { %269 = vadd.xlane.f32.xlu1 %v268_v23  ;;  %257 = vadd.xlane.f32.xlu0 %v256_v25  ;;  %v252_v27 = vmul.f32 %v452_v1, %v550_v21  ;;  %v251_v29 = vmul.f32 %v452_v1, %v552_v22 }
  0x18   : > { %v259_v28 = vsel %vm255_vm0, %v250_v24, 0.0 }
  0x19   : > { %v265_v30 = vsel %vm255_vm0, %v252_v27, 0.0  ;;  %v262_v31 = vsel %vm255_vm0, %v251_v29, 0.0 }
  0x1b   : > { %272 = vadd.xlane.f32.xlu1 %v271_v26  ;;  %260 = vadd.xlane.f32.xlu0 %v259_v28 }
  0x1f   : > { %266 = vadd.xlane.f32.xlu1 %v265_v30  ;;  %263 = vadd.xlane.f32.xlu0 %v262_v31 }
  0xa0   : > { %v270_v33 = vpop.xlane.xlu1 %269  ;;  %v258_v35 = vpop.xlane.xlu0 %257 }
  0xa1   : > { %v285_v36 = vadd.f32 %v453_v34, %v270_v33  ;;  %v281_v37 = vadd.f32 %v453_v34, %v258_v35 }
  0xa3   : > { %v292_v43 = vsel %vm287_vm1, %v285_v36, -inf  ;;  %v288_v44 = vsel %vm287_vm1, %v281_v37, -inf }
  0xa4   : > { %v273_v38 = vpop.xlane.xlu1 %272  ;;  %v261_v40 = vpop.xlane.xlu0 %260  ;;  %v293_v51 = vmax.f32 %v288_v44, %v292_v43 }
  0xa5   : > { %v286_v39 = vadd.f32 %v453_v34, %v273_v38  ;;  %v282_v41 = vadd.f32 %v453_v34, %v261_v40 }
  0xa7   : > { %v294_v42 = vsel %vm287_vm1, %v286_v39, -inf  ;;  %v289_v45 = vsel %vm287_vm1, %v282_v41, -inf }
  0xa8   : > { %v267_v46 = vpop.xlane.xlu1 %266  ;;  %v295_v47 = vmax.f32 %v289_v45, %v294_v42  ;;  %v264_v49 = vpop.xlane.xlu0 %263 }
  0xa9   : > { %v284_v48 = vadd.f32 %v453_v34, %v267_v46  ;;  %v283_v50 = vadd.f32 %v453_v34, %v264_v49 }
  0xaa   : > { %v296_v54 = vmax.f32 %v293_v51, %v295_v47 }
  0xab   : > { %v291_v52 = vsel %vm287_vm1, %v284_v48, -inf  ;;  %v290_v53 = vsel %vm287_vm1, %v283_v50, -inf }
  0xac   : > { %v297_v55 = vmax.f32 %v290_v53, %v291_v52 }
  0xae   : > { %v298_v56 = vmax.f32 %v296_v54, %v297_v55 }
  0xb0   : > { %v299_v57 = vsub.f32 %v281_v37, %v298_v56  ;;  %v301_v58 = vsub.f32 %v283_v50, %v298_v56  ;;  %v300_v59 = vsub.f32 %v282_v41, %v298_v56  ;;  %v302_v61 = vsub.f32 %v284_v48, %v298_v56 }
  0xb1   : > { %v303_v63 = vsub.f32 %v285_v36, %v298_v56  ;;  %v304_v1 = vsub.f32 %v286_v39, %v298_v56 }
  0xb2   : > { %v305_v60 = vmul.f32 1.442695, %v299_v57  ;;  %v309_v62 = vmul.f32 1.442695, %v301_v58  ;;  %v307_v0 = vmul.f32 1.442695, %v300_v59 }
  0xb3   : > { %v311_v2 = vmul.f32 1.442695, %v302_v61  ;;  %v313_v3 = vmul.f32 1.442695, %v303_v63  ;;  %v315_v4 = vmul.f32 1.442695, %v304_v1 }
  0xb4   : > { %468 = vpow2.f32 %v305_v60 }
  0xb5   : > { %470 = vpow2.f32 %v309_v62 }
  0xb6   : > { %472 = vpow2.f32 %v307_v0 }
  0xb7   : > { %474 = vpow2.f32 %v311_v2 }
  0xb8   : > { %476 = vpow2.f32 %v313_v3 }
  0xb9   : > { %478 = vpow2.f32 %v315_v4 }
  0xc1   : > { %v469_v6 = vpop.eup %468 }
  0xc2   : > { %v471_v7 = vpop.eup %470  ;;  %v317_v8 = vsel %vm287_vm1, %v469_v6, 0.0 }
  0xc3   : > { %v473_v11 = vpop.eup %472  ;;  %v320_v16 = vsel %vm287_vm1, %v471_v7, 0.0 }
  0xc4   : > { %v318_v12 = vsel %vm287_vm1, %v473_v11, 0.0  ;;  %v475_v13 = vpop.eup %474 }
  0xc5   : > { %v319_v14 = vadd.f32 %v318_v12, %v317_v8  ;;  %v477_v17 = vpop.eup %476  ;;  %v322_v19 = vsel %vm287_vm1, %v475_v13, 0.0 }
  0xc6   : > { %v479_v20 = vpop.eup %478  ;;  %v324_v24 = vsel %vm287_vm1, %v477_v17, 0.0 }
  0xc7   : > { %v321_v18 = vadd.f32 %v320_v16, %v319_v14  ;;  %v326_v26 = vsel %vm287_vm1, %v479_v20, 0.0 }
  0xc9   : > { %v323_v23 = vadd.f32 %v322_v19, %v321_v18 }
  0xcb   : > { %v325_v25 = vadd.f32 %v324_v24, %v323_v23 }
  0xcd   : > { %v327_v27 = vadd.f32 %v326_v26, %v325_v25 }
  0xcf   : > { %480 = vrcp.f32 %v327_v27 }
  0xdc   : > { %v481_v28 = vpop.eup %480 }
  0xdd   : > { %v330_v29 = vmul.f32 %v481_v28, %v473_v11  ;;  %v329_v30 = vmul.f32 %v481_v28, %v469_v6  ;;  %v331_v31 = vmul.f32 %v481_v28, %v471_v7  ;;  %v332_v32 = vmul.f32 %v481_v28, %v475_v13 }
  0xde   : > { %v333_v33 = vmul.f32 %v481_v28, %v477_v17  ;;  %v334_v34 = vmul.f32 %v481_v28, %v479_v20 }
  0xdf   : > { %342 = vperm.xlu1 %467, %v330_v29   ;;  %337 = vperm.xlu0 %466, %v329_v30  }
  0xe3   : > { %347 = vperm.xlu1 %467, %v331_v31  }
  0xe7   : > { %352 = vperm.xlu1 %467, %v332_v32  }
  0xeb   : > { %357 = vperm.xlu1 %467, %v333_v33  }
  0xef   : > { %362 = vperm.xlu1 %467, %v334_v34  }
 0x15a   : > { %v343_v35 = vpop.permute.xlu1 %342  ;;  %v338_v36 = vpop.permute.xlu0 %337 }
 0x15b   : > { %v366_v37 = vmul.f32 %v343_v35, %v546_v15  ;;  %v365_v38 = vmul.f32 %v338_v36, %v541_v9 }
 0x15d   : > { %372 = vst [vmem:[%s223_s5 + $0x2] sm:$0x3] %v366_v37  ;;  %371 = vst [vmem:[%s223_s5] sm:$0x3] %v365_v38 }
 0x15e   : > { %v348_v39 = vpop.permute.xlu1 %347 }
 0x15f   : > { %v367_v40 = vmul.f32 %v348_v39, %v552_v22 }
 0x161   : > { %373 = vst [vmem:[%s223_s5 + $0x4] sm:$0x3] %v367_v40 }
 0x162   : > { %v353_v41 = vpop.permute.xlu1 %352 }
 0x163   : > { %v368_v42 = vmul.f32 %v353_v41, %v550_v21 }
 0x165   : > { %374 = vst [vmem:[%s223_s5 + $0x6] sm:$0x3] %v368_v42 }
 0x166   : > { %v358_v43 = vpop.permute.xlu1 %357 }
 0x167   : > { %v369_v44 = vmul.f32 %v358_v43, %v539_v5 }
 0x169   : > { %375 = vst [vmem:[%s223_s5 + $0x8] sm:$0x3] %v369_v44 }
 0x16a   : > { %v363_v45 = vpop.permute.xlu1 %362 }
 0x16b   : > { %v370_v46 = vmul.f32 %v363_v45, %v543_v10 }
 0x16d   : > { %376 = vst [vmem:[%s223_s5 + $0xa] sm:$0x3] %v370_v46 }
 0x16e PF: > { %s16_s17 = sadd.s32 1, %s488_s17  }
 0x16f   : > { %p13_p5 = scmp.ge.s32.totalorder %s16_s17, 4  }
 0x171   :  { %15 = sbr.rel (!%p13_p5) target bundleno = 3 (0x3), region = 69 }

// kernel: pctdm_forward.6
= control target key start
LH: loop header
LB: loop body
LE: loop exit
PB: predicated region body
PF: predicated region fallthrough
CT: control target
= control target key end

     0   :  { %s1413_s12 = smov 0   ;;  %s1415_s13 = smov 0   ;;  %s1671_s0 = inlined_call_operand.vmem [shape: f32[2,12,2,512], index: 0, kind: input, shape index: {}]   ;;  %s1672_s1 = inlined_call_operand.vmem [shape: bf16[2,128,512], index: 1, kind: input, shape index: {}]   ;;  %s1673_s2 = inlined_call_operand.vmem [shape: f32[12,2,128], index: 2, kind: output, shape index: {0}]   ;;  %s1674_s3 = inlined_call_operand.vmem [shape: f32[12,2,128], index: 3, kind: output, shape index: {1}]  }
   0x1   :  { %s1417_s14 = smov 0  }
   0x2 LB: > { %s1426_s15 = sadd.s32 4294967295, %s1388_s14   ;;  %s1428_s16 = sadd.s32 1, %s1388_s14   ;;  %s1388_s14 = sphi %s1417_s14, %s1677_s14   ;;  %s1384_s13 = sphi %s1415_s13, %s1676_s13   ;;  %s1380_s12 = sphi %s1413_s12, %s1675_s12  }
   0x3   : > { %s18_s17 = ssub.s32 %s1388_s14, %s1428_s16  ;;  %s21_s18 = sadd.s32 1, %s1384_s13 }
   0x4   : > { %p19_p0 = scmp.eq.s32.totalorder %s18_s17, 0  ;;  %p28_p1 = scmp.ne.s32.totalorder %s1384_s13, %s1380_s12 }
   0x5   : > { %p29_p2 = scmp.eq.s32.totalorder %s1388_s14, 0  ;;  %p1156_p4 = scmp.ge.s32.totalorder %s1388_s14, 12 }
   0x6   : > { %s1435_s19 = scalar_select %p19_p0, %s1384_s13, %s21_s18  }
   0x7   : > { %p30_p3 = por %p29_p2, %p28_p1  ;;  %108 = sbr.rel (%p1156_p4) target bundleno = 18 (0x12), region = 16 }
   0xc   : > { %111 = sbr.rel (!%p30_p3) target bundleno = 18 (0x12), region = 20  ;;  %s113_s20 = sand.u32 (%p30_p3), 1, %s1384_s13  }
   0xd   : > { %s1237_s21 = sshll.u32 (%p30_p3), %s1388_s14, 3  ;;  %s1157_s22 = sshll.u32 (%p30_p3), %s113_s20, 4 }
   0xe   : > { %s118_s25 = scalar_lea.vmem (%p30_p3), %s1671_s0, %s1237_s21  ;;  %s115_s26 = scalar_lea.vmem (%p30_p3), [#allocation6], %s1157_s22 }
   0xf   : > { %v149_v0 = vld [vmem:[%s118_s25] sm:$0xff] (%p30_p3) }
  0x10   : > { %v151_v1 = vld [vmem:[%s118_s25 + $0x60] sm:$0xff] (%p30_p3)  ;;  %150 = vst [vmem:[%s115_s26] sm:$0xff] (%p30_p3), %v149_v0 }
  0x11   : > { %152 = vst [vmem:[%s115_s26 + $0x8] sm:$0xff] %v151_v1 }
  0x12 PF: > { %p1160_p5 = scmp.ge.s32.totalorder %s1388_s14, 1  ;;  %p157_p6 = scmp.lt.s32.totalorder %s1388_s14, 13 }
  0x14   : > { %p158_p7 = pnand %p1160_p5, %p157_p6 }
  0x15   : > { %s164_s27 = sand.u32 (!%p158_p7), 1, %s1380_s12   ;;  %p189_p8 = scmp.lt.s32.totalorder (!%p158_p7), %s1426_s15, 11 }
  0x16   : > { %161 = sbr.rel (%p158_p7) target bundleno = 395 (0x18b), region = 58  ;;  %s1443_s28 = sshll.u32 (!%p158_p7), %s164_s27, 4 }
  0x17   : > { %s193_s29 = ssub.s32 (!%p158_p7), 11, %s1426_s15  ;;  %s166_s12 = scalar_lea.vmem (!%p158_p7), [#allocation6], %s1443_s28 }
  0x18   : > { %p194_p9 = scmp.lt.s32.totalorder (!%p158_p7), %s193_s29, 11  ;;  %p1164_p10 = scmp.ne.s32.totalorder (!%p158_p7), %s1426_s15, 0 }
  0x1b   : > { %s190_s30 = scalar_select %p189_p8, %s1426_s15, 11 }
  0x1c   : > { %s1679_s29 = smov (!%p194_p9, %s193_s29), 11  ;;  %203 = sbr.rel (%p1164_p10) target bundleno = 71 (0x47), region = 66 }
  0x1d   : > { %s1162_s4 = sshll.u32 %s190_s30, 1  ;;  %s1163_s8 = sshll.u32 %s1679_s29, 1 }
  0x1e   : > { %s1450_s7 = scalar_lea.vmem %s1673_s2, %s1162_s4  ;;  %s1455_s11 = scalar_lea.vmem %s1674_s3, %s1163_s8 }
  0x21   : > { %v237_v2 = vld [vmem:[%s1672_s1] sm:$0xff]  ;;  %v239_v3 = vld [vmem:[%s1672_s1 + $0x8] sm:$0xff]  ;;  %v241_v4 = vld [vmem:[%s1672_s1 + $0x10] sm:$0xff] }
  0x22   : > { %238 = vst [vmem:[#allocation4 + $0xb0] sm:$0xff] %v237_v2  ;;  %240 = vst [vmem:[#allocation4 + $0x1b0] sm:$0xff] %v239_v3  ;;  %v243_v5 = vld [vmem:[%s1672_s1 + $0x18] sm:$0xff]  ;;  %v245_v6 = vld [vmem:[%s1672_s1 + $0x20] sm:$0xff] }
  0x23   : > { %242 = vst [vmem:[#allocation4 + $0xd8] sm:$0xff] %v241_v4  ;;  %v247_v7 = vld [vmem:[%s1672_s1 + $0x28] sm:$0xff]  ;;  %244 = vst [vmem:[#allocation4 + $0x18] sm:$0xff] %v243_v5  ;;  %v249_v8 = vld [vmem:[%s1672_s1 + $0x30] sm:$0xff] }
  0x24   : > { %246 = vst [vmem:[#allocation4 + $0x50] sm:$0xff] %v245_v6  ;;  %248 = vst [vmem:[#allocation4 + $0x168] sm:$0xff] %v247_v7  ;;  %v251_v9 = vld [vmem:[%s1672_s1 + $0x38] sm:$0xff]  ;;  %v253_v10 = vld [vmem:[%s1672_s1 + $0x40] sm:$0xff] }
  0x25   : > { %250 = vst [vmem:[#allocation4 + $0x130] sm:$0xff] %v249_v8  ;;  %252 = vst [vmem:[#allocation4 + $0x48] sm:$0xff] %v251_v9  ;;  %v255_v11 = vld [vmem:[%s1672_s1 + $0x48] sm:$0xff]  ;;  %v257_v12 = vld [vmem:[%s1672_s1 + $0x50] sm:$0xff] }
  0x26   : > { %254 = vst [vmem:[#allocation4 + $0x180] sm:$0xff] %v253_v10  ;;  %v259_v13 = vld [vmem:[%s1672_s1 + $0x58] sm:$0xff]  ;;  %256 = vst [vmem:[#allocation4 + $0x110] sm:$0xff] %v255_v11  ;;  %v261_v14 = vld [vmem:[%s1672_s1 + $0x60] sm:$0xff] }
  0x27   : > { %258 = vst [vmem:[#allocation4 + $0x118] sm:$0xff] %v257_v12  ;;  %260 = vst [vmem:[#allocation4 + $0x98] sm:$0xff] %v259_v13  ;;  %v263_v15 = vld [vmem:[%s1672_s1 + $0x68] sm:$0xff]  ;;  %v265_v16 = vld [vmem:[%s1672_s1 + $0x70] sm:$0xff] }
  0x28   : > { %262 = vst [vmem:[#allocation4 + $0x120] sm:$0xff] %v261_v14  ;;  %264 = vst [vmem:[#allocation4 + $0x150] sm:$0xff] %v263_v15  ;;  %v267_v17 = vld [vmem:[%s1672_s1 + $0x78] sm:$0xff]  ;;  %v269_v18 = vld [vmem:[%s1672_s1 + $0x80] sm:$0xff] }
  0x29   : > { %266 = vst [vmem:[#allocation4 + $0x108] sm:$0xff] %v265_v16  ;;  %v271_v19 = vld [vmem:[%s1672_s1 + $0x88] sm:$0xff]  ;;  %268 = vst [vmem:[#allocation4 + $0x60] sm:$0xff] %v267_v17  ;;  %v273_v20 = vld [vmem:[%s1672_s1 + $0x90] sm:$0xff] }
  0x2a   : > { %270 = vst [vmem:[#allocation4 + $0xe0] sm:$0xff] %v269_v18  ;;  %272 = vst [vmem:[#allocation4 + $0x188] sm:$0xff] %v271_v19  ;;  %v275_v21 = vld [vmem:[%s1672_s1 + $0x98] sm:$0xff]  ;;  %v277_v22 = vld [vmem:[%s1672_s1 + $0xa0] sm:$0xff] }
  0x2b   : > { %274 = vst [vmem:[#allocation4 + $0x138] sm:$0xff] %v273_v20  ;;  %276 = vst [vmem:[#allocation4 + $0x140] sm:$0xff] %v275_v21  ;;  %v279_v23 = vld [vmem:[%s1672_s1 + $0xa8] sm:$0xff]  ;;  %v281_v24 = vld [vmem:[%s1672_s1 + $0xb0] sm:$0xff] }
  0x2c   : > { %278 = vst [vmem:[#allocation4 + $0x80] sm:$0xff] %v277_v22  ;;  %v283_v25 = vld [vmem:[%s1672_s1 + $0xb8] sm:$0xff]  ;;  %280 = vst [vmem:[#allocation4 + $0x1a8] sm:$0xff] %v279_v23  ;;  %v285_v26 = vld [vmem:[%s1672_s1 + $0xc0] sm:$0xff] }
  0x2d   : > { %282 = vst [vmem:[#allocation4 + $0x1b8] sm:$0xff] %v281_v24  ;;  %284 = vst [vmem:[#allocation4 + $0x28] sm:$0xff] %v283_v25  ;;  %v287_v27 = vld [vmem:[%s1672_s1 + $0xc8] sm:$0xff]  ;;  %v289_v28 = vld [vmem:[%s1672_s1 + $0xd0] sm:$0xff] }
  0x2e   : > { %286 = vst [vmem:[#allocation4 + $0x1e8] sm:$0xff] %v285_v26  ;;  %288 = vst [vmem:[#allocation4 + $0xf8] sm:$0xff] %v287_v27  ;;  %v291_v29 = vld [vmem:[%s1672_s1 + $0xd8] sm:$0xff]  ;;  %v293_v30 = vld [vmem:[%s1672_s1 + $0xe0] sm:$0xff] }
  0x2f   : > { %290 = vst [vmem:[#allocation4 + $0x160] sm:$0xff] %v289_v28  ;;  %v295_v31 = vld [vmem:[%s1672_s1 + $0xe8] sm:$0xff]  ;;  %292 = vst [vmem:[#allocation4 + $0x30] sm:$0xff] %v291_v29  ;;  %v297_v32 = vld [vmem:[%s1672_s1 + $0xf0] sm:$0xff] }
  0x30   : > { %294 = vst [vmem:[#allocation4 + $0x1e0] sm:$0xff] %v293_v30  ;;  %296 = vst [vmem:[#allocation4] sm:$0xff] %v295_v31  ;;  %v299_v33 = vld [vmem:[%s1672_s1 + $0xf8] sm:$0xff]  ;;  %v301_v34 = vld [vmem:[%s1672_s1 + $0x100] sm:$0xff] }
  0x31   : > { %298 = vst [vmem:[#allocation4 + $0xf0] sm:$0xff] %v297_v32  ;;  %300 = vst [vmem:[#allocation4 + $0x8] sm:$0xff] %v299_v33  ;;  %v303_v35 = vld [vmem:[%s1672_s1 + $0x108] sm:$0xff]  ;;  %v305_v36 = vld [vmem:[%s1672_s1 + $0x110] sm:$0xff] }
  0x32   : > { %302 = vst [vmem:[#allocation4 + $0x148] sm:$0xff] %v301_v34  ;;  %v307_v37 = vld [vmem:[%s1672_s1 + $0x118] sm:$0xff]  ;;  %304 = vst [vmem:[#allocation4 + $0x1d0] sm:$0xff] %v303_v35  ;;  %v309_v38 = vld [vmem:[%s1672_s1 + $0x120] sm:$0xff] }
  0x33   : > { %306 = vst [vmem:[#allocation4 + $0x100] sm:$0xff] %v305_v36  ;;  %308 = vst [vmem:[#allocation4 + $0xc8] sm:$0xff] %v307_v37  ;;  %v311_v39 = vld [vmem:[%s1672_s1 + $0x128] sm:$0xff]  ;;  %v313_v40 = vld [vmem:[%s1672_s1 + $0x130] sm:$0xff] }
  0x34   : > { %310 = vst [vmem:[#allocation4 + $0x40] sm:$0xff] %v309_v38  ;;  %312 = vst [vmem:[#allocation4 + $0x1f8] sm:$0xff] %v311_v39  ;;  %v315_v41 = vld [vmem:[%s1672_s1 + $0x138] sm:$0xff]  ;;  %v317_v42 = vld [vmem:[%s1672_s1 + $0x140] sm:$0xff] }
  0x35   : > { %314 = vst [vmem:[#allocation4 + $0x20] sm:$0xff] %v313_v40  ;;  %v319_v43 = vld [vmem:[%s1672_s1 + $0x148] sm:$0xff]  ;;  %316 = vst [vmem:[#allocation4 + $0x128] sm:$0xff] %v315_v41  ;;  %v321_v44 = vld [vmem:[%s1672_s1 + $0x150] sm:$0xff] }
  0x36   : > { %318 = vst [vmem:[#allocation4 + $0x1a0] sm:$0xff] %v317_v42  ;;  %320 = vst [vmem:[#allocation4 + $0x1f0] sm:$0xff] %v319_v43  ;;  %v323_v45 = vld [vmem:[%s1672_s1 + $0x158] sm:$0xff]  ;;  %v325_v46 = vld [vmem:[%s1672_s1 + $0x160] sm:$0xff] }
  0x37   : > { %322 = vst [vmem:[#allocation4 + $0xe8] sm:$0xff] %v321_v44  ;;  %324 = vst [vmem:[#allocation4 + $0x78] sm:$0xff] %v323_v45  ;;  %v327_v47 = vld [vmem:[%s1672_s1 + $0x168] sm:$0xff]  ;;  %v329_v48 = vld [vmem:[%s1672_s1 + $0x170] sm:$0xff] }
  0x38   : > { %326 = vst [vmem:[#allocation4 + $0x70] sm:$0xff] %v325_v46  ;;  %v331_v49 = vld [vmem:[%s1672_s1 + $0x178] sm:$0xff]  ;;  %328 = vst [vmem:[#allocation4 + $0x90] sm:$0xff] %v327_v47  ;;  %v333_v50 = vld [vmem:[%s1672_s1 + $0x180] sm:$0xff] }
  0x39   : > { %330 = vst [vmem:[#allocation4 + $0x1d8] sm:$0xff] %v329_v48  ;;  %332 = vst [vmem:[#allocation4 + $0xd0] sm:$0xff] %v331_v49  ;;  %v335_v51 = vld [vmem:[%s1672_s1 + $0x188] sm:$0xff]  ;;  %v337_v52 = vld [vmem:[%s1672_s1 + $0x190] sm:$0xff] }
  0x3a   : > { %334 = vst [vmem:[#allocation4 + $0xb8] sm:$0xff] %v333_v50  ;;  %336 = vst [vmem:[#allocation4 + $0x88] sm:$0xff] %v335_v51  ;;  %v339_v53 = vld [vmem:[%s1672_s1 + $0x198] sm:$0xff]  ;;  %v341_v54 = vld [vmem:[%s1672_s1 + $0x1a0] sm:$0xff] }
  0x3b   : > { %338 = vst [vmem:[#allocation4 + $0xa8] sm:$0xff] %v337_v52  ;;  %v343_v55 = vld [vmem:[%s1672_s1 + $0x1a8] sm:$0xff]  ;;  %340 = vst [vmem:[#allocation4 + $0x1c8] sm:$0xff] %v339_v53  ;;  %v345_v56 = vld [vmem:[%s1672_s1 + $0x1b0] sm:$0xff] }
  0x3c   : > { %342 = vst [vmem:[#allocation4 + $0x170] sm:$0xff] %v341_v54  ;;  %344 = vst [vmem:[#allocation4 + $0x178] sm:$0xff] %v343_v55  ;;  %v347_v57 = vld [vmem:[%s1672_s1 + $0x1b8] sm:$0xff]  ;;  %v349_v58 = vld [vmem:[%s1672_s1 + $0x1c0] sm:$0xff] }
  0x3d   : > { %346 = vst [vmem:[#allocation4 + $0x68] sm:$0xff] %v345_v56  ;;  %348 = vst [vmem:[#allocation4 + $0x190] sm:$0xff] %v347_v57  ;;  %v351_v59 = vld [vmem:[%s1672_s1 + $0x1c8] sm:$0xff]  ;;  %v353_v60 = vld [vmem:[%s1672_s1 + $0x1d0] sm:$0xff] }
  0x3e   : > { %350 = vst [vmem:[#allocation4 + $0x198] sm:$0xff] %v349_v58  ;;  %v355_v61 = vld [vmem:[%s1672_s1 + $0x1d8] sm:$0xff]  ;;  %352 = vst [vmem:[#allocation4 + $0x38] sm:$0xff] %v351_v59  ;;  %v357_v62 = vld [vmem:[%s1672_s1 + $0x1e0] sm:$0xff] }
  0x3f   : > { %354 = vst [vmem:[#allocation4 + $0xc0] sm:$0xff] %v353_v60  ;;  %356 = vst [vmem:[#allocation4 + $0x1c0] sm:$0xff] %v355_v61  ;;  %v359_v63 = vld [vmem:[%s1672_s1 + $0x1e8] sm:$0xff]  ;;  %v361_v0 = vld [vmem:[%s1672_s1 + $0x1f0] sm:$0xff] }
  0x40   : > { %358 = vst [vmem:[#allocation4 + $0x158] sm:$0xff] %v357_v62  ;;  %360 = vst [vmem:[#allocation4 + $0x10] sm:$0xff] %v359_v63  ;;  %v363_v1 = vld [vmem:[%s1672_s1 + $0x1f8] sm:$0xff] }
  0x41   : > { %362 = vst [vmem:[#allocation4 + $0x58] sm:$0xff] %v361_v0  ;;  %364 = vst [vmem:[#allocation4 + $0xa0] sm:$0xff] %v363_v1 }
  0x42   : > { %372 = vsyncadd [#allocation5], 8192  ;;  %v1390_v2 = vmov 0.0  }
  0x43   : > { %373 = vst [vmem:[#allocation2] sm:$0x3] %v1390_v2  ;;  %374 = vst [vmem:[#allocation2 + $0x2] sm:$0x3] %v1390_v2 }
  0x44   : > { %375 = vst [vmem:[#allocation3] sm:$0x3] %v1390_v2  ;;  %376 = vst [vmem:[#allocation3 + $0x2] sm:$0x3] %v1390_v2 }
  0x45   : > { %1376 = dma.done.wait [#allocation5], 8192 }
  0x46   : > { %1377 = vsyncadd [#allocation5], 4294959104 }
  0x47 PF: > { %v1265_v3 = vld [vmem:[#allocation4 + $0x1e4] ss:$-240 sps:$4 sm:$0xff]   ;;  %v1391_v5 = vmov 0   ;;  %v1269_v6 = vld [vmem:[#allocation4 + $0x1e0] ss:$-240 sps:$4 sm:$0xff]   ;;  %v406_v13 = vld [vmem:[#allocation4 + $0x1a8] sm:$0xff] }
  0x48   : > { %v1267_v4 = vld [vmem:[#allocation4 + $0x4] ss:$8 sps:$4 sm:$0xff]   ;;  %609 = vmatprep.mubr.bf16.mxu0 %v1391_v5  ;;  %650 = vmatprep.mubr.bf16.mxu1 %v1391_v5  ;;  %v1270_v7 = vld [vmem:[#allocation4] ss:$8 sps:$4 sm:$0xff]   ;;  %v1273_v9 = vld [vmem:[#allocation4 + $0xfc] ss:$-200 sps:$4 sm:$0xff]  }
  0x49   : > { %577 = vmatprep.subr.bf16.mxu0 %v1265_v3  ;;  %618 = vmatprep.subr.bf16.mxu1 %v1267_v4  ;;  %v1271_v8 = vld [vmem:[#allocation4 + $0x1ec] ss:$-136 sps:$4 sm:$0xff]   ;;  %v1275_v10 = vld [vmem:[#allocation4 + $0x1e8] ss:$-136 sps:$4 sm:$0xff]   ;;  %v1276_v11 = vld [vmem:[#allocation4 + $0xf8] ss:$-200 sps:$4 sm:$0xff]  }
  0x4a   : > { %578 = vmatpush1.bf16.msra.mxu0 %v1269_v6  ;;  %619 = vmatpush1.bf16.msra.mxu1 %v1270_v7  ;;  %v1277_v12 = vld [vmem:[#allocation4 + $0x84] ss:$312 sps:$4 sm:$0xff]   ;;  %v408_v14 = vld [vmem:[#allocation4 + $0x28] sm:$0xff]  ;;  %v1279_v16 = vld [vmem:[#allocation4 + $0x80] ss:$312 sps:$4 sm:$0xff]  }
  0x4b   : > { %579 = vmatprep.subr.bf16.mxu0 %v1271_v8  ;;  %620 = vmatprep.subr.bf16.mxu1 %v1273_v9  ;;  %v1188_v15 = vcombine.high %v406_v13, %v408_v14  ;;  %v1187_v17 = vcombine.low %v406_v13, %v408_v14  ;;  %v1280_v18 = vld [vmem:[#allocation4 + $0xe4] ss:$88 sps:$4 sm:$0xff]   ;;  %v1284_v20 = vld [vmem:[#allocation4 + $0xe0] ss:$88 sps:$4 sm:$0xff]   ;;  %v389_v28 = vld [vmem:[#allocation4 + $0x50] sm:$0xff] }
  0x4c   : > { %v1282_v19 = vld [vmem:[#allocation4 + $0x18c] ss:$-72 sps:$4 sm:$0xff]   ;;  %v1285_v21 = vld [vmem:[#allocation4 + $0x188] ss:$-72 sps:$4 sm:$0xff]   ;;  %v1294_v27 = vld [vmem:[#allocation4 + $0x114] ss:$-120 sps:$4 sm:$0xff]  }
  0x4d   : > { %v1286_v22 = vld [vmem:[#allocation4 + $0x124] ss:$-24 sps:$4 sm:$0xff]   ;;  %v1290_v24 = vld [vmem:[#allocation4 + $0x120] ss:$-24 sps:$4 sm:$0xff]   ;;  %v391_v29 = vld [vmem:[#allocation4 + $0x130] sm:$0xff] }
  0x4e   : > { %580 = vmatpush1.bf16.msra.mxu0 %v1275_v10  ;;  %621 = vmatpush1.bf16.msra.mxu1 %v1276_v11  ;;  %v1288_v23 = vld [vmem:[#allocation4 + $0x154] ss:$-240 sps:$4 sm:$0xff]   ;;  %v1291_v25 = vld [vmem:[#allocation4 + $0x150] ss:$-240 sps:$4 sm:$0xff]   ;;  %v390_v30 = vld [vmem:[#allocation4 + $0x168] sm:$0xff]  ;;  %v1170_v34 = vcombine.high %v389_v28, %v391_v29  ;;  %v1169_v36 = vcombine.low %v389_v28, %v391_v29 }
  0x4f   : > { %581 = vmatprep.subr.bf16.mxu0 %v1277_v12  ;;  %622 = vmatprep.subr.bf16.mxu1 %v1188_v15  ;;  %v1292_v26 = vld [vmem:[#allocation4 + $0x184] ss:$-104 sps:$4 sm:$0xff]   ;;  %v392_v31 = vld [vmem:[#allocation4 + $0x48] sm:$0xff]  ;;  %v1296_v32 = vld [vmem:[#allocation4 + $0x180] ss:$-104 sps:$4 sm:$0xff]  }
  0x50   : > { %v1297_v33 = vld [vmem:[#allocation4 + $0x110] ss:$-120 sps:$4 sm:$0xff]   ;;  %v1172_v35 = vcombine.high %v390_v30, %v392_v31  ;;  %v1171_v37 = vcombine.low %v390_v30, %v392_v31  ;;  %v1298_v38 = vld [vmem:[#allocation4 + $0xb4] ss:$40 sps:$4 sm:$0xff]   ;;  %v734_v56 = vld [vmem:[#allocation4 + $0x88] sm:$0xff] }
  0x51   : > { %v1300_v39 = vld [vmem:[#allocation4 + $0x1b4] ss:$-408 sps:$4 sm:$0xff]   ;;  %v1302_v42 = vld [vmem:[#allocation4 + $0xb0] ss:$40 sps:$4 sm:$0xff]   ;;  %v736_v57 = vld [vmem:[#allocation4 + $0x1c8] sm:$0xff] }
  0x52   : > { %582 = vmatpush1.bf16.msra.mxu0 %v1279_v16  ;;  %623 = vmatpush1.bf16.msra.mxu1 %v1187_v17  ;;  %v745_v40 = vld [vmem:[#allocation4 + $0x158] sm:$0xff]  ;;  %v1306_v46 = vld [vmem:[#allocation4 + $0x14] ss:$144 sps:$4 sm:$0xff]   ;;  %v1304_v49 = vld [vmem:[#allocation4 + $0x10] ss:$144 sps:$4 sm:$0xff]   ;;  %v1219_v61 = vcombine.high %v734_v56, %v736_v57  ;;  %v1218_v1 = vcombine.low %v734_v56, %v736_v57 }
  0x53   : > { %583 = vmatprep.subr.bf16.mxu0 %v1280_v18  ;;  %624 = vmatprep.subr.bf16.mxu1 %v1282_v19  ;;  %v747_v41 = vld [vmem:[#allocation4 + $0x58] sm:$0xff]  ;;  %v1315_v54 = vld [vmem:[#allocation4 + $0x174] ss:$-264 sps:$4 sm:$0xff]   ;;  %v1313_v58 = vld [vmem:[#allocation4 + $0x170] ss:$-264 sps:$4 sm:$0xff]  }
  0x54   : > { %v1303_v43 = vld [vmem:[#allocation4 + $0x1b0] ss:$-408 sps:$4 sm:$0xff]   ;;  %v1229_v45 = vcombine.high %v745_v40, %v747_v41  ;;  %v1228_v48 = vcombine.low %v745_v40, %v747_v41  ;;  %v1309_v50 = vld [vmem:[#allocation4 + $0x19c] ss:$-216 sps:$4 sm:$0xff]   ;;  %v1325_v10 = vld [vmem:[#allocation4 + $0x1a0] ss:$-184 sps:$4 sm:$0xff]  }
  0x55   : > { %v383_v44 = vld [vmem:[#allocation2] sm:$0x3]  ;;  %v1312_v51 = vld [vmem:[#allocation4 + $0x3c] ss:$392 sps:$4 sm:$0xff]   ;;  %v730_v62 = vld [vmem:[#allocation4 + $0x90] sm:$0xff] }
  0x56   : > { %584 = vmatpush1.bf16.msra.mxu0 %v1284_v20  ;;  %625 = vmatpush1.bf16.msra.mxu1 %v1285_v21  ;;  %v384_v47 = vpack.c.bf16 %v383_v44, %v383_v44  ;;  %v1307_v52 = vld [vmem:[#allocation4 + $0x198] ss:$-216 sps:$4 sm:$0xff]   ;;  %v1318_v55 = vld [vmem:[#allocation4 + $0x17c] ss:$24 sps:$4 sm:$0xff]   ;;  %v1327_v6 = vld [vmem:[#allocation4 + $0x1a4] ss:$-184 sps:$4 sm:$0xff]  }
  0x57   : > { %585 = vmatprep.subr.bf16.mxu0 %v1286_v22  ;;  %626 = vmatprep.subr.bf16.mxu1 %v1288_v23  ;;  %v1310_v53 = vld [vmem:[#allocation4 + $0x38] ss:$392 sps:$4 sm:$0xff]   ;;  %v1321_v60 = vld [vmem:[#allocation4 + $0xbc] ss:$-16 sps:$4 sm:$0xff]   ;;  %v732_v63 = vld [vmem:[#allocation4 + $0xd0] sm:$0xff] }
  0x58   : > { %v1316_v59 = vld [vmem:[#allocation4 + $0x178] ss:$24 sps:$4 sm:$0xff]   ;;  %v1324_v2 = vld [vmem:[#allocation4 + $0x74] ss:$360 sps:$4 sm:$0xff]   ;;  %v1215_v3 = vcombine.high %v730_v62, %v732_v63  ;;  %v721_v8 = vld [vmem:[#allocation4 + $0x40] sm:$0xff] }
  0x59   : > { %v1319_v0 = vld [vmem:[#allocation4 + $0xb8] ss:$-16 sps:$4 sm:$0xff]   ;;  %v1330_v7 = vld [vmem:[#allocation4 + $0x1f4] ss:$-376 sps:$4 sm:$0xff]   ;;  %v723_v9 = vld [vmem:[#allocation4 + $0x20] sm:$0xff] }
  0x5a   : > { %586 = vmatpush1.bf16.msra.mxu0 %v1290_v24  ;;  %627 = vmatpush1.bf16.msra.mxu1 %v1291_v25  ;;  %v1322_v4 = vld [vmem:[#allocation4 + $0x70] ss:$360 sps:$4 sm:$0xff]   ;;  %v1205_v12 = vcombine.high %v721_v8, %v723_v9  ;;  %v1333_v13 = vld [vmem:[#allocation4 + $0x1fc] ss:$-208 sps:$4 sm:$0xff]   ;;  %v1204_v14 = vcombine.low %v721_v8, %v723_v9  ;;  %v1334_v18 = vld [vmem:[#allocation4 + $0x148] ss:$-72 sps:$4 sm:$0xff]   ;;  %v668_v24 = vlaneseq }
  0x5b   : > { %587 = vmatprep.subr.bf16.mxu0 %v1292_v26  ;;  %628 = vmatprep.subr.bf16.mxu1 %v1294_v27  ;;  %v1328_v11 = vld [vmem:[#allocation4 + $0x1f0] ss:$-376 sps:$4 sm:$0xff]   ;;  %v1336_v16 = vld [vmem:[#allocation4 + $0x14c] ss:$-72 sps:$4 sm:$0xff]   ;;  %v1392_v22 = vmov 1983009808  }
  0x5c   : > { %v1331_v15 = vld [vmem:[#allocation4 + $0x1f8] ss:$-208 sps:$4 sm:$0xff]   ;;  %v1339_v17 = vld [vmem:[#allocation4 + $0x1d4] ss:$-264 sps:$4 sm:$0xff]   ;;  %v666_v23 = vunpack.c.l.s4 %v1392_v22  ;;  %v669_v26 = vshrl.u32 %v668_v24, 7 }
  0x5d   : > { %v1337_v19 = vld [vmem:[#allocation4 + $0x1d0] ss:$-264 sps:$4 sm:$0xff]   ;;  %v714_v20 = vld [vmem:[#allocation2 + $0x2] sm:$0x3] }
  0x5e   : > { %588 = vmatpush1.bf16.msra.mxu0 %v1296_v32  ;;  %629 = vmatpush1.bf16.msra.mxu1 %v1297_v33  ;;  %v715_v21 = vpack.c.bf16 %v714_v20, %v714_v20  ;;  %v667_v25 = vunpack.c.0.s8 %v666_v23  ;;  %v1033_v20 = vld [vmem:[#allocation3 + $0x2] sm:$0x3] }
  0x5f   : > { %589 = vmatprep.subr.bf16.mxu0 %v1170_v34  ;;  %630 = vmatprep.subr.bf16.mxu1 %v1172_v35 }
  0x60   : > { %v670_v29 = vsub.s32 %v667_v25, %v669_v26 }
  0x62   : > { %590 = vmatpush1.bf16.msra.mxu0 %v1169_v36  ;;  %631 = vmatpush1.bf16.msra.mxu1 %v1171_v37 }
  0x63   : > { %591 = vmatprep.subr.bf16.mxu0 %v1298_v38  ;;  %632 = vmatprep.subr.bf16.mxu1 %v1300_v39  ;;  %v382_v38 = vld [vmem:[%s166_s12] sm:$0xff] }
  0x66   : > { %592 = vmatpush1.bf16.msra.mxu0 %v1302_v42  ;;  %633 = vmatpush1.bf16.msra.mxu1 %v1303_v43 }
  0x67   : > { %909 = vmatprep.subr.bf16.mxu0 %v1229_v45  ;;  %950 = vmatprep.subr.bf16.mxu1 %v1306_v46 }
  0x69   : > { %610 = vmatmul.mubr.bf16.vlgmr.msra.gmra.mxu0 %v384_v47  ;;  %651 = vmatmul.mubr.bf16.vlgmr.msra.gmra.mxu1 %v384_v47 }
  0x6a   : > { %910 = vmatpush1.bf16.msra.mxu0 %v1228_v48  ;;  %951 = vmatpush1.bf16.msra.mxu1 %v1304_v49 }
  0x6b   : > { %911 = vmatprep.subr.bf16.mxu0 %v1309_v50  ;;  %952 = vmatprep.subr.bf16.mxu1 %v1312_v51 }
  0x6c   : > { %941 = vmatprep.mubr.bf16.mxu0 %v1391_v5  ;;  %982 = vmatprep.mubr.bf16.mxu1 %v1391_v5  ;;  %v1214_v5 = vcombine.low %v730_v62, %v732_v63 }
  0x6e   : > { %912 = vmatpush1.bf16.msra.mxu0 %v1307_v52  ;;  %953 = vmatpush1.bf16.msra.mxu1 %v1310_v53 }
  0x6f   : > { %913 = vmatprep.subr.bf16.mxu0 %v1315_v54  ;;  %954 = vmatprep.subr.bf16.mxu1 %v1318_v55 }
  0x72   : > { %914 = vmatpush1.bf16.msra.mxu0 %v1313_v58  ;;  %955 = vmatpush1.bf16.msra.mxu1 %v1316_v59  ;;  %v1199_v59 = vld [vmem:[%s166_s12 + $0x8] sm:$0xff] }
  0x73   : > { %915 = vmatprep.subr.bf16.mxu0 %v1321_v60  ;;  %956 = vmatprep.subr.bf16.mxu1 %v1219_v61 }
  0x76   : > { %916 = vmatpush1.bf16.msra.mxu0 %v1319_v0  ;;  %957 = vmatpush1.bf16.msra.mxu1 %v1218_v1 }
  0x77   : > { %917 = vmatprep.subr.bf16.mxu0 %v1324_v2  ;;  %958 = vmatprep.subr.bf16.mxu1 %v1215_v3  ;;  %v700_v2 = vld [vmem:[#allocation3] sm:$0x3] }
  0x7a   : > { %918 = vmatpush1.bf16.msra.mxu0 %v1322_v4  ;;  %959 = vmatpush1.bf16.msra.mxu1 %v1214_v5 }
  0x7b   : > { %919 = vmatprep.subr.bf16.mxu0 %v1327_v6  ;;  %960 = vmatprep.subr.bf16.mxu1 %v1330_v7 }
  0x7e   : > { %920 = vmatpush1.bf16.msra.mxu0 %v1325_v10  ;;  %961 = vmatpush1.bf16.msra.mxu1 %v1328_v11 }
  0x7f   : > { %921 = vmatprep.subr.bf16.mxu0 %v1205_v12  ;;  %962 = vmatprep.subr.bf16.mxu1 %v1333_v13 }
  0x82   : > { %922 = vmatpush1.bf16.msra.mxu0 %v1204_v14  ;;  %963 = vmatpush1.bf16.msra.mxu1 %v1331_v15 }
  0x83   : > { %923 = vmatprep.subr.bf16.mxu0 %v1336_v16  ;;  %964 = vmatprep.subr.bf16.mxu1 %v1339_v17 }
  0x86   : > { %924 = vmatpush1.bf16.msra.mxu0 %v1334_v18  ;;  %965 = vmatpush1.bf16.msra.mxu1 %v1337_v19 }
  0x89   : > { %942 = vmatmul.mubr.bf16.vlgmr.msra.gmra.mxu0 %v715_v21  ;;  %983 = vmatmul.mubr.bf16.vlgmr.msra.gmra.mxu1 %v715_v21 }
 0x129   : > { %v611_v27 = vpop.f32.mrf.mxu0  ;;  %v652_v28 = vpop.f32.mrf.mxu1 }
 0x12b   : > { %v613_v30 = vpop.f32.mrf.mxu0  ;;  %v654_v31 = vpop.f32.mrf.mxu1 }
 0x12c   : > { %v663_v32 = vcombine.low %v611_v27, %v613_v30  ;;  %v664_v33 = vcombine.low %v652_v28, %v654_v31 }
 0x12d   : > { %v615_v34 = vpop.f32.mrf.mxu0  ;;  %v656_v35 = vpop.f32.mrf.mxu1 }
 0x12e   : > { %v671_v36 = vrot.slane %v663_v32, %v670_v29  ;;  %v678_v37 = vrot.slane %v664_v33, %v670_v29 }
 0x12f   : > { %v616_v39 = vpop.f32.mrf.mxu0  ;;  %v657_v40 = vpop.f32.mrf.mxu1 }
 0x130   : > { %v679_v41 = vcombine.low %v671_v36, %v678_v37 }
 0x132   : > { %v681_v42 = vadd.f32 %v679_v41, %v382_v38 }
 0x134   : > { %v1197_v43 = vmul.f32 -1.442695, %v681_v42  ;;  %v692_v44 = vrot.slane %v681_v42, 6  ;;  %v689_v48 = vrot.slane %v681_v42, 4 }
 0x136   : > { %1340 = vpow2.f32 %v1197_v43  ;;  %v1198_v45 = vmul.f32 -1.442695, %v692_v44 }
 0x138   : > { %1342 = vpow2.f32 %v1198_v45 }
 0x143   : > { %v1341_v46 = vpop.eup %1340 }
 0x144   : > { %v685_v47 = vadd.f32 1.0, %v1341_v46 }
 0x145   : > { %v1343_v63 = vpop.eup %1342 }
 0x146   : > { %1344 = vrcp.f32 %v685_v47  ;;  %v697_v6 = vadd.f32 1.0, %v1343_v63 }
 0x147   : > { %1346 = vtanh.f32 %v689_v48 }
 0x149   : > { %v943_v49 = vpop.f32.mrf.mxu0  ;;  %v984_v50 = vpop.f32.mrf.mxu1 }
 0x14b   : > { %v945_v51 = vpop.f32.mrf.mxu0  ;;  %v986_v52 = vpop.f32.mrf.mxu1 }
 0x14c   : > { %v995_v53 = vcombine.low %v943_v49, %v945_v51  ;;  %v996_v54 = vcombine.low %v984_v50, %v986_v52 }
 0x14d   : > { %v947_v55 = vpop.f32.mrf.mxu0  ;;  %v988_v56 = vpop.f32.mrf.mxu1 }
 0x14e   : > { %v1003_v57 = vrot.slane %v995_v53, %v670_v29  ;;  %v1010_v58 = vrot.slane %v996_v54, %v670_v29 }
 0x14f   : > { %v948_v60 = vpop.f32.mrf.mxu0  ;;  %v989_v61 = vpop.f32.mrf.mxu1 }
 0x150   : > { %v1011_v62 = vcombine.low %v1003_v57, %v1010_v58 }
 0x152   : > { %v1013_v0 = vadd.f32 %v1199_v59, %v1011_v62 }
 0x153   : > { %v1345_v1 = vpop.eup %1344 }
 0x154   : > { %v702_v3 = vrot.slane %v1345_v1, 2  ;;  %v1232_v4 = vmul.f32 -1.442695, %v1013_v0  ;;  %v1347_v5 = vpop.eup %1346  ;;  %v1024_v10 = vrot.slane %v1013_v0, 6  ;;  %v1021_v14 = vrot.slane %v1013_v0, 4 }
 0x155   : > { %v705_v8 = vmul.f32 %v1347_v5, %v1345_v1 }
 0x156   : > { %v704_v7 = vmul.f32 %v702_v3, %v700_v2  ;;  %1348 = vpow2.f32 %v1232_v4  ;;  %v1233_v11 = vmul.f32 -1.442695, %v1024_v10 }
 0x157   : > { %1350 = vrcp.f32 %v697_v6 }
 0x158   : > { %v706_v9 = vadd.f32 %v705_v8, %v704_v7 }
 0x15a   : > { %1352 = vtanh.f32 %v706_v9  ;;  %709 = vst [vmem:[#allocation3] sm:$0x3] %v706_v9 }
 0x15b   : > { %1354 = vpow2.f32 %v1233_v11 }
 0x163   : > { %v1349_v12 = vpop.eup %1348 }
 0x164   : > { %v1017_v13 = vadd.f32 1.0, %v1349_v12  ;;  %v1351_v15 = vpop.eup %1350 }
 0x166   : > { %1356 = vrcp.f32 %v1017_v13 }
 0x167   : > { %v1353_v16 = vpop.eup %1352  ;;  %1358 = vtanh.f32 %v1021_v14 }
 0x168   : > { %v708_v17 = vmul.f32 %v1353_v16, %v1351_v15  ;;  %v1355_v18 = vpop.eup %1354 }
 0x169   : > { %v1029_v23 = vadd.f32 1.0, %v1355_v18 }
 0x16a   : > { %710 = vst [vmem:[#allocation2] sm:$0x3] %v708_v17  ;;  %1044 = vst [vmem:[%s1450_s7] sm:$0x3] %v708_v17 }
 0x16b   : > { %1360 = vrcp.f32 %v1029_v23 }
 0x173   : > { %v1357_v19 = vpop.eup %1356 }
 0x174   : > { %v1035_v21 = vrot.slane %v1357_v19, 2  ;;  %v1359_v22 = vpop.eup %1358 }
 0x175   : > { %v1038_v25 = vmul.f32 %v1359_v22, %v1357_v19 }
 0x176   : > { %v1037_v24 = vmul.f32 %v1035_v21, %v1033_v20 }
 0x178   : > { %v1039_v26 = vadd.f32 %v1038_v25, %v1037_v24  ;;  %v1361_v27 = vpop.eup %1360 }
 0x17a   : > { %1362 = vtanh.f32 %v1039_v26  ;;  %1042 = vst [vmem:[#allocation3 + $0x2] sm:$0x3] %v1039_v26 }
 0x187   : > { %v1363_v28 = vpop.eup %1362 }
 0x188   : > { %v1041_v29 = vmul.f32 %v1363_v28, %v1361_v27 }
 0x18a   : > { %1043 = vst [vmem:[#allocation2 + $0x2] sm:$0x3] %v1041_v29  ;;  %1045 = vst [vmem:[%s1455_s11] sm:$0x3] %v1041_v29 }
 0x18b PF: > { %p11_p11 = scmp.ge.s32.totalorder %s1428_s16, 14   ;;  %s1675_s12 = smov %s1384_s13 }
 0x18c   : > { %s1676_s13 = smov %s1435_s19  ;;  %s1677_s14 = smov %s1428_s16 }
 0x18d   :  { %13 = sbr.rel (!%p11_p11) target bundleno = 2 (0x2), region = 159 }
 0x192   :  { %1082 = vsyncmov [#allocation5] }
 0x195   :  { %s1083_s28 = vpop.sfrf %1082 }
 0x196   :  { %p1236_p12 = scmp.ne.s32.totalorder %s1083_s28, 0 }
 0x198   :  { %1087 = shalt.err (%p1236_p12)  }

// kernel: pctdm_forward.8
= control target key start
LH: loop header
LB: loop body
LE: loop exit
PB: predicated region body
PF: predicated region fallthrough
CT: control target
= control target key end

     0   :  { %v524_v1 = vmov 0   ;;  %v391_v35 = vlaneseq  ;;  %s690_s1 = inlined_call_operand.vmem [shape: bf16[128,512], index: 1, kind: input, shape index: {}]   ;;  %s691_s0 = inlined_call_operand.vmem [shape: bf16[24,128], index: 0, kind: input, shape index: {}]   ;;  %s692_s2 = inlined_call_operand.vmem [shape: f32[1,512], index: 2, kind: input, shape index: {}]   ;;  %s693_s3 = inlined_call_operand.vmem [shape: f32[24,512], index: 3, kind: output, shape index: {}]  }
   0x1   :  { %v474_v0 = vld [vmem:[%s690_s1 + $0xe4] ss:$16 sps:$4 sm:$0xff]   ;;  %280 = vmatprep.mubr.bf16.mxu0 %v524_v1  ;;  %331 = vmatprep.mubr.bf16.mxu1 %v524_v1  ;;  %v476_v2 = vld [vmem:[%s690_s1 + $0xec] ss:$16 sps:$4 sm:$0xff]   ;;  %v478_v3 = vld [vmem:[%s690_s1 + $0xe0] ss:$16 sps:$4 sm:$0xff]  }
   0x2   :  { %248 = vmatprep.subr.bf16.mxu0 %v474_v0  ;;  %v479_v4 = vld [vmem:[%s690_s1 + $0xe8] ss:$16 sps:$4 sm:$0xff]   ;;  %299 = vmatprep.subr.bf16.mxu1 %v476_v2  ;;  %v480_v5 = vld [vmem:[%s690_s1 + $0xc4] ss:$16 sps:$4 sm:$0xff]   ;;  %v482_v6 = vld [vmem:[%s690_s1 + $0xcc] ss:$16 sps:$4 sm:$0xff]  }
   0x3   :  { %249 = vmatpush1.bf16.msra.mxu0 %v478_v3  ;;  %300 = vmatpush1.bf16.msra.mxu1 %v479_v4  ;;  %v484_v7 = vld [vmem:[%s690_s1 + $0xc0] ss:$16 sps:$4 sm:$0xff]   ;;  %v485_v8 = vld [vmem:[%s690_s1 + $0xc8] ss:$16 sps:$4 sm:$0xff]   ;;  %v486_v9 = vld [vmem:[%s690_s1 + $0xa4] ss:$16 sps:$4 sm:$0xff]  }
   0x4   :  { %250 = vmatprep.subr.bf16.mxu0 %v480_v5  ;;  %301 = vmatprep.subr.bf16.mxu1 %v482_v6  ;;  %v488_v10 = vld [vmem:[%s690_s1 + $0xac] ss:$16 sps:$4 sm:$0xff]   ;;  %v490_v11 = vld [vmem:[%s690_s1 + $0xa0] ss:$16 sps:$4 sm:$0xff]   ;;  %v491_v12 = vld [vmem:[%s690_s1 + $0xa8] ss:$16 sps:$4 sm:$0xff]  }
   0x5   :  { %v492_v13 = vld [vmem:[%s690_s1 + $0x84] ss:$16 sps:$4 sm:$0xff]   ;;  %v494_v14 = vld [vmem:[%s690_s1 + $0x8c] ss:$16 sps:$4 sm:$0xff]   ;;  %v496_v15 = vld [vmem:[%s690_s1 + $0x80] ss:$16 sps:$4 sm:$0xff]  }
   0x6   :  { %v497_v16 = vld [vmem:[%s690_s1 + $0x88] ss:$16 sps:$4 sm:$0xff]   ;;  %v498_v17 = vld [vmem:[%s690_s1 + $0x64] ss:$16 sps:$4 sm:$0xff]   ;;  %v500_v18 = vld [vmem:[%s690_s1 + $0x6c] ss:$16 sps:$4 sm:$0xff]  }
   0x7   :  { %251 = vmatpush1.bf16.msra.mxu0 %v484_v7  ;;  %302 = vmatpush1.bf16.msra.mxu1 %v485_v8  ;;  %v502_v19 = vld [vmem:[%s690_s1 + $0x60] ss:$16 sps:$4 sm:$0xff]   ;;  %v503_v20 = vld [vmem:[%s690_s1 + $0x68] ss:$16 sps:$4 sm:$0xff]   ;;  %v504_v21 = vld [vmem:[%s690_s1 + $0x44] ss:$16 sps:$4 sm:$0xff]  }
   0x8   :  { %252 = vmatprep.subr.bf16.mxu0 %v486_v9  ;;  %303 = vmatprep.subr.bf16.mxu1 %v488_v10  ;;  %v506_v22 = vld [vmem:[%s690_s1 + $0x4c] ss:$16 sps:$4 sm:$0xff]   ;;  %v508_v23 = vld [vmem:[%s690_s1 + $0x40] ss:$16 sps:$4 sm:$0xff]   ;;  %v509_v24 = vld [vmem:[%s690_s1 + $0x48] ss:$16 sps:$4 sm:$0xff]  }
   0x9   :  { %v510_v25 = vld [vmem:[%s690_s1 + $0x24] ss:$16 sps:$4 sm:$0xff]   ;;  %v512_v26 = vld [vmem:[%s690_s1 + $0x2c] ss:$16 sps:$4 sm:$0xff]   ;;  %v514_v27 = vld [vmem:[%s690_s1 + $0x20] ss:$16 sps:$4 sm:$0xff]  }
   0xa   :  { %v515_v28 = vld [vmem:[%s690_s1 + $0x28] ss:$16 sps:$4 sm:$0xff]   ;;  %v516_v29 = vld [vmem:[%s690_s1 + $0x4] ss:$16 sps:$4 sm:$0xff]   ;;  %v518_v30 = vld [vmem:[%s690_s1 + $0xc] ss:$16 sps:$4 sm:$0xff]  }
   0xb   :  { %253 = vmatpush1.bf16.msra.mxu0 %v490_v11  ;;  %304 = vmatpush1.bf16.msra.mxu1 %v491_v12  ;;  %v520_v31 = vld [vmem:[%s690_s1] ss:$16 sps:$4 sm:$0xff]   ;;  %v521_v32 = vld [vmem:[%s690_s1 + $0x8] ss:$16 sps:$4 sm:$0xff]   ;;  %v392_v36 = vshrl.u32 %v391_v35, 7 }
   0xc   :  { %254 = vmatprep.subr.bf16.mxu0 %v492_v13  ;;  %305 = vmatprep.subr.bf16.mxu1 %v494_v14  ;;  %v522_v33 = vld [vmem:[%s691_s0] sm:$0xff]   ;;  %v523_v34 = vld [vmem:[%s691_s0 + $0x8] ss:$0 sps:$4 sm:$0xff]  }
   0xd   :  { %v393_v37 = vsub.s32 0, %v392_v36  ;;  %v401_v38 = vsub.s32 2, %v392_v36  ;;  %v389_v39 = vld [vmem:[%s692_s2] sm:$0xf]  ;;  %v397_v40 = vsub.s32 1, %v392_v36  ;;  %v405_v41 = vsub.s32 3, %v392_v36 }
   0xf   :  { %255 = vmatpush1.bf16.msra.mxu0 %v496_v15  ;;  %306 = vmatpush1.bf16.msra.mxu1 %v497_v16  ;;  %v394_v42 = vrot.slane %v389_v39, %v393_v37  ;;  %v402_v43 = vrot.slane %v389_v39, %v401_v38  ;;  %v398_v44 = vrot.slane %v389_v39, %v397_v40 }
  0x10   :  { %256 = vmatprep.subr.bf16.mxu0 %v498_v17  ;;  %307 = vmatprep.subr.bf16.mxu1 %v500_v18  ;;  %v406_v45 = vrot.slane %v389_v39, %v405_v41 }
  0x13   :  { %257 = vmatpush1.bf16.msra.mxu0 %v502_v19  ;;  %308 = vmatpush1.bf16.msra.mxu1 %v503_v20 }
  0x14   :  { %258 = vmatprep.subr.bf16.mxu0 %v504_v21  ;;  %309 = vmatprep.subr.bf16.mxu1 %v506_v22 }
  0x17   :  { %259 = vmatpush1.bf16.msra.mxu0 %v508_v23  ;;  %310 = vmatpush1.bf16.msra.mxu1 %v509_v24 }
  0x18   :  { %260 = vmatprep.subr.bf16.mxu0 %v510_v25  ;;  %311 = vmatprep.subr.bf16.mxu1 %v512_v26 }
  0x1b   :  { %261 = vmatpush1.bf16.msra.mxu0 %v514_v27  ;;  %312 = vmatpush1.bf16.msra.mxu1 %v515_v28 }
  0x1c   :  { %262 = vmatprep.subr.bf16.mxu0 %v516_v29  ;;  %313 = vmatprep.subr.bf16.mxu1 %v518_v30 }
  0x1f   :  { %263 = vmatpush1.bf16.msra.mxu0 %v520_v31  ;;  %314 = vmatpush1.bf16.msra.mxu1 %v521_v32 }
  0x22   :  { %281 = vmatmul.mubr.bf16.vlgmr.msra.gmra.mxu0 %v522_v33  ;;  %332 = vmatmul.mubr.bf16.vlgmr.msra.gmra.mxu1 %v522_v33 }
  0x23   :  { %290 = vmatprep.mubr.bf16.mxu0 %v524_v1  ;;  %341 = vmatprep.mubr.bf16.mxu1 %v524_v1 }
  0x2a   :  { %291 = vmatmul.mubr.bf16.gmra.mxu0 %v523_v34  ;;  %342 = vmatmul.mubr.bf16.gmra.mxu1 %v523_v34 }
  0xe2   :  { %v282_v46 = vpop.f32.mrf.mxu0  ;;  %v333_v47 = vpop.f32.mrf.mxu1 }
  0xe3   :  { %v411_v48 = vadd.f32 %v394_v42, %v282_v46  ;;  %v413_v49 = vadd.f32 %v402_v43, %v333_v47 }
  0xe4   :  { %v284_v50 = vpop.f32.mrf.mxu0  ;;  %v335_v51 = vpop.f32.mrf.mxu1 }
  0xe5   :  { %423 = vst [vmem:[%s693_s3] sm:$0xff] %v411_v48  ;;  %425 = vst [vmem:[%s693_s3 + $0x10] sm:$0xff] %v413_v49  ;;  %v412_v52 = vadd.f32 %v398_v44, %v284_v50  ;;  %v414_v53 = vadd.f32 %v406_v45, %v335_v51 }
  0xe6   :  { %v286_v54 = vpop.f32.mrf.mxu0  ;;  %v337_v55 = vpop.f32.mrf.mxu1 }
  0xe7   :  { %424 = vst [vmem:[%s693_s3 + $0x8] sm:$0xff] %v412_v52  ;;  %426 = vst [vmem:[%s693_s3 + $0x18] sm:$0xff] %v414_v53  ;;  %v415_v56 = vadd.f32 %v394_v42, %v286_v54  ;;  %v417_v57 = vadd.f32 %v402_v43, %v337_v55 }
  0xe8   :  { %v288_v58 = vpop.f32.mrf.mxu0  ;;  %v339_v59 = vpop.f32.mrf.mxu1 }
  0xe9   :  { %427 = vst [vmem:[%s693_s3 + $0x20] sm:$0xff] %v415_v56  ;;  %429 = vst [vmem:[%s693_s3 + $0x30] sm:$0xff] %v417_v57  ;;  %v416_v60 = vadd.f32 %v398_v44, %v288_v58  ;;  %v418_v61 = vadd.f32 %v406_v45, %v339_v59 }
  0xea   :  { %v292_v62 = vpop.f32.mrf.mxu0  ;;  %v343_v63 = vpop.f32.mrf.mxu1 }
  0xeb   :  { %428 = vst [vmem:[%s693_s3 + $0x28] sm:$0xff] %v416_v60  ;;  %430 = vst [vmem:[%s693_s3 + $0x38] sm:$0xff] %v418_v61  ;;  %v419_v0 = vadd.f32 %v394_v42, %v292_v62  ;;  %v421_v1 = vadd.f32 %v402_v43, %v343_v63 }
  0xec   :  { %v294_v2 = vpop.f32.mrf.mxu0  ;;  %v345_v3 = vpop.f32.mrf.mxu1 }
  0xed   :  { %431 = vst [vmem:[%s693_s3 + $0x40] sm:$0xff] %v419_v0  ;;  %433 = vst [vmem:[%s693_s3 + $0x50] sm:$0xff] %v421_v1  ;;  %v420_v4 = vadd.f32 %v398_v44, %v294_v2  ;;  %v422_v5 = vadd.f32 %v406_v45, %v345_v3 }
  0xee   :  { %v296_v6 = vpop.f32.mrf.mxu0  ;;  %v347_v7 = vpop.f32.mrf.mxu1 }
  0xef   :  { %432 = vst [vmem:[%s693_s3 + $0x48] sm:$0xff] %v420_v4  ;;  %434 = vst [vmem:[%s693_s3 + $0x58] sm:$0xff] %v422_v5 }
  0xf0   :  { %v297_v8 = vpop.f32.mrf.mxu0  ;;  %v348_v9 = vpop.f32.mrf.mxu1 }

// kernel: pctdm_forward.9
= control target key start
LH: loop header
LB: loop body
LE: loop exit
PB: predicated region body
PF: predicated region fallthrough
CT: control target
= control target key end

     0   :  { %11 = vsyncpa [#allocation7], 0  ;;  %s1366_s0 = inlined_call_operand.vmem [shape: f32[6,4,512], index: 0, kind: input, shape index: {}]   ;;  %s1367_s1 = inlined_call_operand.vmem [shape: bf16[128,512], index: 1, kind: input, shape index: {}]   ;;  %s1368_s2 = inlined_call_operand.vmem [shape: bf16[256,8], index: 2, kind: input, shape index: {}]   ;;  %s1369_s3 = inlined_call_operand.vmem [shape: f32[1,8], index: 3, kind: input, shape index: {}]   ;;  %s1370_s4 = inlined_call_operand.hbm [shape: f32[2,256], index: 4, kind: output, shape index: {0}]   ;;  %s1371_s5 = inlined_call_operand.hbm [shape: f32[2,8], index: 5, kind: output, shape index: {1}]  }
   0x1   :  { %12 = vsyncpa [#allocation9], 0  ;;  %s1172_s18 = smov 0  }
   0x2 LB: > { %s1178_s19 = sadd.s32 4294967295, %s1136_s18   ;;  %p897_p0 = scmp.ge.s32.totalorder %s1136_s18, 1  ;;  %s1136_s18 = sphi %s1172_s18, %s18_s18  }
   0x3   : > { %p158_p1 = scmp.lt.s32.totalorder %s1136_s18, 7 }
   0x5   : > { %p159_p2 = pnand %p897_p0, %p158_p1 }
   0x6   : > { %p179_p3 = scmp.lt.s32.totalorder (!%p159_p2), %s1178_s19, 5  ;;  %p900_p4 = scmp.ne.s32.totalorder (!%p159_p2), %s1178_s19, 0 }
   0x7   : > { %162 = sbr.rel (%p159_p2) target bundleno = 591 (0x24f), region = 32 }
   0xc   : > { %s180_s20 = scalar_select %p179_p3, %s1178_s19, 5 }
   0xd   : > { %188 = sbr.rel (%p900_p4) target bundleno = 39 (0x27), region = 36 }
   0xe   : > { %s961_s21 = sshll.u32 %s180_s20, 4 }
   0xf   : > { %s1187_s24 = scalar_lea.vmem %s1366_s0, %s961_s21 }
  0x12   : > { %v222_v0 = vld [vmem:[%s1367_s1] sm:$0xff]  ;;  %v224_v1 = vld [vmem:[%s1367_s1 + $0x8] sm:$0xff]  ;;  %v226_v2 = vld [vmem:[%s1367_s1 + $0x10] sm:$0xff] }
  0x13   : > { %223 = vst [vmem:[#allocation4 + $0xb0] sm:$0xff] %v222_v0  ;;  %225 = vst [vmem:[#allocation4] sm:$0xff] %v224_v1  ;;  %v228_v3 = vld [vmem:[%s1367_s1 + $0x18] sm:$0xff]  ;;  %v230_v4 = vld [vmem:[%s1367_s1 + $0x20] sm:$0xff] }
  0x14   : > { %227 = vst [vmem:[#allocation4 + $0xd8] sm:$0xff] %v226_v2  ;;  %v232_v5 = vld [vmem:[%s1367_s1 + $0x28] sm:$0xff]  ;;  %229 = vst [vmem:[#allocation4 + $0x18] sm:$0xff] %v228_v3  ;;  %v234_v6 = vld [vmem:[%s1367_s1 + $0x30] sm:$0xff] }
  0x15   : > { %231 = vst [vmem:[#allocation4 + $0x50] sm:$0xff] %v230_v4  ;;  %233 = vst [vmem:[#allocation4 + $0x68] sm:$0xff] %v232_v5  ;;  %v236_v7 = vld [vmem:[%s1367_s1 + $0x38] sm:$0xff]  ;;  %v238_v8 = vld [vmem:[%s1367_s1 + $0x40] sm:$0xff] }
  0x16   : > { %235 = vst [vmem:[#allocation4 + $0x30] sm:$0xff] %v234_v6  ;;  %237 = vst [vmem:[#allocation4 + $0x48] sm:$0xff] %v236_v7  ;;  %v240_v9 = vld [vmem:[%s1367_s1 + $0x48] sm:$0xff]  ;;  %v242_v10 = vld [vmem:[%s1367_s1 + $0x50] sm:$0xff] }
  0x17   : > { %239 = vst [vmem:[#allocation4 + $0x80] sm:$0xff] %v238_v8  ;;  %v244_v11 = vld [vmem:[%s1367_s1 + $0x58] sm:$0xff]  ;;  %241 = vst [vmem:[#allocation4 + $0x88] sm:$0xff] %v240_v9  ;;  %v246_v12 = vld [vmem:[%s1367_s1 + $0x60] sm:$0xff] }
  0x18   : > { %243 = vst [vmem:[#allocation4 + $0xe8] sm:$0xff] %v242_v10  ;;  %245 = vst [vmem:[#allocation4 + $0xb8] sm:$0xff] %v244_v11  ;;  %v248_v13 = vld [vmem:[%s1367_s1 + $0x68] sm:$0xff]  ;;  %v250_v14 = vld [vmem:[%s1367_s1 + $0x70] sm:$0xff] }
  0x19   : > { %247 = vst [vmem:[#allocation4 + $0x60] sm:$0xff] %v246_v12  ;;  %249 = vst [vmem:[#allocation4 + $0xf0] sm:$0xff] %v248_v13  ;;  %v252_v15 = vld [vmem:[%s1367_s1 + $0x78] sm:$0xff]  ;;  %v254_v16 = vld [vmem:[%s1367_s1 + $0x80] sm:$0xff] }
  0x1a   : > { %251 = vst [vmem:[#allocation4 + $0x8] sm:$0xff] %v250_v14  ;;  %v256_v17 = vld [vmem:[%s1367_s1 + $0x88] sm:$0xff]  ;;  %253 = vst [vmem:[#allocation4 + $0x78] sm:$0xff] %v252_v15  ;;  %v258_v18 = vld [vmem:[%s1367_s1 + $0x90] sm:$0xff] }
  0x1b   : > { %255 = vst [vmem:[#allocation4 + $0x38] sm:$0xff] %v254_v16  ;;  %257 = vst [vmem:[#allocation4 + $0x58] sm:$0xff] %v256_v17  ;;  %v260_v19 = vld [vmem:[%s1367_s1 + $0x98] sm:$0xff]  ;;  %v262_v20 = vld [vmem:[%s1367_s1 + $0xa0] sm:$0xff] }
  0x1c   : > { %259 = vst [vmem:[#allocation4 + $0x40] sm:$0xff] %v258_v18  ;;  %261 = vst [vmem:[#allocation4 + $0xc8] sm:$0xff] %v260_v19  ;;  %v264_v21 = vld [vmem:[%s1367_s1 + $0xa8] sm:$0xff]  ;;  %v266_v22 = vld [vmem:[%s1367_s1 + $0xb0] sm:$0xff] }
  0x1d   : > { %263 = vst [vmem:[#allocation4 + $0xe0] sm:$0xff] %v262_v20  ;;  %v268_v23 = vld [vmem:[%s1367_s1 + $0xb8] sm:$0xff]  ;;  %265 = vst [vmem:[#allocation4 + $0x90] sm:$0xff] %v264_v21  ;;  %v270_v24 = vld [vmem:[%s1367_s1 + $0xc0] sm:$0xff] }
  0x1e   : > { %267 = vst [vmem:[#allocation4 + $0x70] sm:$0xff] %v266_v22  ;;  %269 = vst [vmem:[#allocation4 + $0xc0] sm:$0xff] %v268_v23  ;;  %v272_v25 = vld [vmem:[%s1367_s1 + $0xc8] sm:$0xff]  ;;  %v274_v26 = vld [vmem:[%s1367_s1 + $0xd0] sm:$0xff] }
  0x1f   : > { %271 = vst [vmem:[#allocation4 + $0xa8] sm:$0xff] %v270_v24  ;;  %273 = vst [vmem:[#allocation4 + $0xd0] sm:$0xff] %v272_v25  ;;  %v276_v27 = vld [vmem:[%s1367_s1 + $0xd8] sm:$0xff]  ;;  %v278_v28 = vld [vmem:[%s1367_s1 + $0xe0] sm:$0xff] }
  0x20   : > { %275 = vst [vmem:[#allocation4 + $0x10] sm:$0xff] %v274_v26  ;;  %v280_v29 = vld [vmem:[%s1367_s1 + $0xe8] sm:$0xff]  ;;  %277 = vst [vmem:[#allocation4 + $0x28] sm:$0xff] %v276_v27  ;;  %v282_v30 = vld [vmem:[%s1367_s1 + $0xf0] sm:$0xff] }
  0x21   : > { %279 = vst [vmem:[#allocation4 + $0xa0] sm:$0xff] %v278_v28  ;;  %281 = vst [vmem:[#allocation4 + $0xf8] sm:$0xff] %v280_v29  ;;  %v284_v31 = vld [vmem:[%s1367_s1 + $0xf8] sm:$0xff] }
  0x22   : > { %283 = vst [vmem:[#allocation4 + $0x20] sm:$0xff] %v282_v30  ;;  %285 = vst [vmem:[#allocation4 + $0x98] sm:$0xff] %v284_v31 }
  0x23   : > { %293 = vsyncadd [#allocation5], 4096  ;;  %v1138_v32 = vmov 0.0  }
  0x24   : > { %294 = vst [vmem:[#allocation2] sm:$0xf] %v1138_v32  ;;  %295 = vst [vmem:[#allocation3] sm:$0xf] %v1138_v32 }
  0x25   : > { %1124 = dma.done.wait [#allocation5], 4096 }
  0x26   : > { %1125 = vsyncadd [#allocation5], 4294963200 }
  0x27 PF: > { %v1008_v37 = vld [vmem:[#allocation4 + $0xac] ss:$-152 sps:$4 sm:$0xff]   ;;  %v1139_v38 = vmov 0   ;;  %v1010_v39 = vld [vmem:[#allocation4 + $0xa8] ss:$-152 sps:$4 sm:$0xff]   ;;  %v300_v13 = vld [vmem:[%s1187_s24] sm:$0xff] }
  0x28   : > { %v332_v33 = vld [vmem:[#allocation4 + $0xa0] sm:$0xff]  ;;  %528 = vmatprep.mubr.bf16.mxu0 %v1139_v38  ;;  %569 = vmatprep.mubr.bf16.mxu1 %v1139_v38  ;;  %v333_v40 = vld [vmem:[#allocation4 + $0xf8] sm:$0xff]  ;;  %v1019_v47 = vld [vmem:[#allocation4 + $0xd4] ss:$-168 sps:$4 sm:$0xff]   ;;  %p935_p5 = scmp.ne.s32.totalorder %s1178_s19, 5 }
  0x29   : > { %v334_v34 = vld [vmem:[#allocation4 + $0x20] sm:$0xff]  ;;  %v335_v41 = vld [vmem:[#allocation4 + $0x98] sm:$0xff]  ;;  %v1022_v48 = vld [vmem:[#allocation4 + $0xd0] ss:$-168 sps:$4 sm:$0xff]  }
  0x2a   : > { %v930_v35 = vcombine.high %v332_v33, %v334_v34  ;;  %v929_v36 = vcombine.low %v332_v33, %v334_v34  ;;  %v1011_v42 = vld [vmem:[#allocation4 + $0xe4] ss:$-112 sps:$4 sm:$0xff]   ;;  %v932_v43 = vcombine.high %v333_v40, %v335_v41  ;;  %v931_v44 = vcombine.low %v333_v40, %v335_v41  ;;  %v1013_v45 = vld [vmem:[#allocation4 + $0xe0] ss:$-112 sps:$4 sm:$0xff]   ;;  %v1029_v53 = vld [vmem:[#allocation4 + $0x5c] ss:$112 sps:$4 sm:$0xff]  }
  0x2b   : > { %v1014_v46 = vld [vmem:[#allocation4 + $0x3c] ss:$8 sps:$4 sm:$0xff]   ;;  %v1016_v50 = vld [vmem:[#allocation4 + $0x38] ss:$8 sps:$4 sm:$0xff]   ;;  %v308_v58 = vld [vmem:[#allocation4 + $0x50] sm:$0xff] }
  0x2c   : > { %496 = vmatprep.subr.bf16.mxu0 %v930_v35  ;;  %537 = vmatprep.subr.bf16.mxu1 %v932_v43  ;;  %v1025_v49 = vld [vmem:[#allocation4 + $0x94] ss:$48 sps:$4 sm:$0xff]   ;;  %v1028_v52 = vld [vmem:[#allocation4 + $0x90] ss:$48 sps:$4 sm:$0xff]   ;;  %v1031_v55 = vld [vmem:[#allocation4 + $0x58] ss:$112 sps:$4 sm:$0xff]  }
  0x2d   : > { %497 = vmatpush1.bf16.msra.mxu0 %v929_v36  ;;  %538 = vmatpush1.bf16.msra.mxu1 %v931_v44  ;;  %v1017_v51 = vld [vmem:[#allocation4 + $0x64] ss:$-88 sps:$4 sm:$0xff]   ;;  %v1021_v54 = vld [vmem:[#allocation4 + $0x60] ss:$-88 sps:$4 sm:$0xff]   ;;  %v1034_v57 = vld [vmem:[#allocation4 + $0xf4] ss:$-120 sps:$4 sm:$0xff]  }
  0x2e   : > { %498 = vmatprep.subr.bf16.mxu0 %v1008_v37  ;;  %539 = vmatprep.subr.bf16.mxu1 %v1019_v47  ;;  %v1023_v56 = vld [vmem:[#allocation4 + $0x84] ss:$104 sps:$4 sm:$0xff]   ;;  %v310_v59 = vld [vmem:[#allocation4 + $0x30] sm:$0xff]  ;;  %v1027_v60 = vld [vmem:[#allocation4 + $0x80] ss:$104 sps:$4 sm:$0xff]  }
  0x2f   : > { %v1037_v61 = vld [vmem:[#allocation4 + $0xf0] ss:$-120 sps:$4 sm:$0xff]   ;;  %v906_v62 = vcombine.high %v308_v58, %v310_v59  ;;  %v1038_v63 = vld [vmem:[#allocation4 + $0x8c] ss:$48 sps:$4 sm:$0xff]   ;;  %v905_v2 = vcombine.low %v308_v58, %v310_v59  ;;  %v301_v24 = vld [vmem:[%s1187_s24 + $0x8] sm:$0xff] }
  0x30   : > { %v309_v0 = vld [vmem:[#allocation4 + $0x68] sm:$0xff]  ;;  %v1032_v4 = vld [vmem:[#allocation4 + $0xb4] ss:$40 sps:$4 sm:$0xff]   ;;  %v1036_v6 = vld [vmem:[#allocation4 + $0xb0] ss:$40 sps:$4 sm:$0xff]  }
  0x31   : > { %499 = vmatpush1.bf16.msra.mxu0 %v1010_v39  ;;  %540 = vmatpush1.bf16.msra.mxu1 %v1022_v48  ;;  %v311_v1 = vld [vmem:[#allocation4 + $0x48] sm:$0xff]  ;;  %v302_v7 = vld [vmem:[#allocation2] sm:$0xf]  ;;  %v1041_v9 = vld [vmem:[#allocation4 + $0x4] ss:$24 sps:$4 sm:$0xff]  }
  0x32   : > { %500 = vmatprep.subr.bf16.mxu0 %v1011_v42  ;;  %541 = vmatprep.subr.bf16.mxu1 %v1025_v49  ;;  %v1040_v3 = vld [vmem:[#allocation4 + $0x88] ss:$48 sps:$4 sm:$0xff]   ;;  %v908_v5 = vcombine.high %v309_v0, %v311_v1  ;;  %v907_v8 = vcombine.low %v309_v0, %v311_v1  ;;  %v303_v10 = vpack.c.bf16 %v302_v7, %v302_v7  ;;  %v604_v33 = vld [vmem:[#allocation3] sm:$0xf] }
  0x33   : > { %v1043_v11 = vld [vmem:[#allocation4] ss:$24 sps:$4 sm:$0xff]  }
  0x35   : > { %501 = vmatpush1.bf16.msra.mxu0 %v1013_v45  ;;  %542 = vmatpush1.bf16.msra.mxu1 %v1028_v52 }
  0x36   : > { %502 = vmatprep.subr.bf16.mxu0 %v1014_v46  ;;  %543 = vmatprep.subr.bf16.mxu1 %v1029_v53 }
  0x39   : > { %503 = vmatpush1.bf16.msra.mxu0 %v1016_v50  ;;  %544 = vmatpush1.bf16.msra.mxu1 %v1031_v55 }
  0x3a   : > { %504 = vmatprep.subr.bf16.mxu0 %v1017_v51  ;;  %545 = vmatprep.subr.bf16.mxu1 %v1034_v57 }
  0x3d   : > { %505 = vmatpush1.bf16.msra.mxu0 %v1021_v54  ;;  %546 = vmatpush1.bf16.msra.mxu1 %v1037_v61 }
  0x3e   : > { %506 = vmatprep.subr.bf16.mxu0 %v1023_v56  ;;  %547 = vmatprep.subr.bf16.mxu1 %v1038_v63 }
  0x41   : > { %507 = vmatpush1.bf16.msra.mxu0 %v1027_v60  ;;  %548 = vmatpush1.bf16.msra.mxu1 %v1040_v3 }
  0x42   : > { %508 = vmatprep.subr.bf16.mxu0 %v906_v62  ;;  %549 = vmatprep.subr.bf16.mxu1 %v908_v5 }
  0x45   : > { %509 = vmatpush1.bf16.msra.mxu0 %v905_v2  ;;  %550 = vmatpush1.bf16.msra.mxu1 %v907_v8 }
  0x46   : > { %510 = vmatprep.subr.bf16.mxu0 %v1032_v4  ;;  %551 = vmatprep.subr.bf16.mxu1 %v1041_v9 }
  0x49   : > { %511 = vmatpush1.bf16.msra.mxu0 %v1036_v6  ;;  %552 = vmatpush1.bf16.msra.mxu1 %v1043_v11 }
  0x4c   : > { %529 = vmatmul.mubr.bf16.vlgmr.msra.gmra.mxu0 %v303_v10  ;;  %570 = vmatmul.mubr.bf16.vlgmr.msra.gmra.mxu1 %v303_v10 }
 0x10c   : > { %v530_v12 = vpop.f32.mrf.mxu0  ;;  %v571_v17 = vpop.f32.mrf.mxu1 }
 0x10e   : > { %v532_v14 = vpop.f32.mrf.mxu0  ;;  %v573_v20 = vpop.f32.mrf.mxu1 }
 0x10f   : > { %v582_v15 = vcombine.low %v530_v12, %v532_v14  ;;  %v583_v22 = vcombine.low %v571_v17, %v573_v20 }
 0x110   : > { %v534_v16 = vpop.f32.mrf.mxu0  ;;  %v575_v23 = vpop.f32.mrf.mxu1 }
 0x111   : > { %v586_v18 = vadd.f32 %v582_v15, %v300_v13  ;;  %v587_v26 = vadd.f32 %v583_v22, %v301_v24 }
 0x112   : > { %v535_v19 = vpop.f32.mrf.mxu0  ;;  %v576_v25 = vpop.f32.mrf.mxu1 }
 0x113   : > { %v933_v21 = vmul.f32 -1.442695, %v586_v18  ;;  %v596_v27 = vrot.slane %v587_v26, 4 }
 0x115   : > { %1044 = vpow2.f32 %v933_v21  ;;  %v934_v28 = vmul.f32 -1.442695, %v596_v27 }
 0x117   : > { %1046 = vpow2.f32 %v934_v28 }
 0x122   : > { %v1045_v29 = vpop.eup %1044 }
 0x123   : > { %v591_v30 = vadd.f32 1.0, %v1045_v29 }
 0x124   : > { %v1047_v31 = vpop.eup %1046 }
 0x125   : > { %1048 = vrcp.f32 %v591_v30  ;;  %v601_v36 = vadd.f32 1.0, %v1047_v31 }
 0x126   : > { %1050 = vtanh.f32 %v587_v26 }
 0x127   : > { %1052 = vrcp.f32 %v601_v36 }
 0x132   : > { %v1049_v32 = vpop.eup %1048 }
 0x133   : > { %v606_v34 = vrot.slane %v1049_v32, 4  ;;  %v1051_v35 = vpop.eup %1050 }
 0x134   : > { %v609_v38 = vmul.f32 %v1051_v35, %v1049_v32  ;;  %v1053_v40 = vpop.eup %1052 }
 0x135   : > { %v608_v37 = vmul.f32 %v606_v34, %v604_v33 }
 0x137   : > { %v610_v39 = vadd.f32 %v609_v38, %v608_v37 }
 0x139   : > { %1054 = vtanh.f32 %v610_v39  ;;  %613 = vst [vmem:[#allocation3] sm:$0xf] %v610_v39 }
 0x145   : > { %618 = sbr.rel (%p935_p5) target bundleno = 563 (0x233), region = 74 }
 0x146   : > { %v1055_v41 = vpop.eup %1054 }
 0x147   : > { %v612_v42 = vmul.f32 %v1055_v41, %v1053_v40 }
 0x149   : > { %614 = vst [vmem:[#allocation2] sm:$0xf] %v612_v42 }
 0x14a   : > { %v1056_v43 = vld [vmem:[%s1368_s2 + $0x78] sm:$0xff]   ;;  %v1058_v45 = vld [vmem:[%s1368_s2 + $0x70] sm:$0xff]   ;;  %v1060_v47 = vld [vmem:[%s1368_s2 + $0x68] sm:$0xff]   ;;  %vm810_vm0 = vcmask 58368  }
 0x14b   : > { %v1057_v44 = vld [vmem:[%s1368_s2 + $0x38] sm:$0xff]   ;;  %962 = vmatprep.subr.bf16.mxu0 %v1056_v43  ;;  %v1059_v46 = vld [vmem:[%s1368_s2 + $0x30] sm:$0xff]   ;;  %v1061_v48 = vld [vmem:[%s1368_s2 + $0x28] sm:$0xff]  }
 0x14c   : > { %963 = vmatpush3.bf16.msra.mxu0 %v1057_v44  ;;  %v1062_v49 = vld [vmem:[%s1368_s2 + $0x60] sm:$0xff]   ;;  %v1064_v51 = vld [vmem:[%s1368_s2 + $0x58] sm:$0xff]   ;;  %v1066_v53 = vld [vmem:[%s1368_s2 + $0x50] sm:$0xff]  }
 0x14d   : > { %964 = vmatprep.subr.bf16.mxu0 %v1058_v45  ;;  %v1063_v50 = vld [vmem:[%s1368_s2 + $0x20] sm:$0xff]   ;;  %v1065_v52 = vld [vmem:[%s1368_s2 + $0x18] sm:$0xff]   ;;  %v1067_v58 = vld [vmem:[%s1368_s2 + $0x10] sm:$0xff]  }
 0x14e   : > { %v1068_v59 = vld [vmem:[%s1368_s2 + $0x48] sm:$0xff]   ;;  %v1070_v61 = vld [vmem:[%s1368_s2 + $0x40] sm:$0xff]  }
 0x14f   : > { %v1069_v60 = vld [vmem:[%s1368_s2 + $0x8] sm:$0xff]   ;;  %v1071_v62 = vld [vmem:[%s1368_s2] sm:$0xff]  }
 0x150   : > { %965 = vmatpush3.bf16.msra.mxu0 %v1059_v46  ;;  %v619_v54 = vld [vmem:[#allocation2] sm:$0x3]  ;;  %v620_v55 = vld [vmem:[#allocation2 + $0x2] sm:$0x3] }
 0x151   : > { %966 = vmatprep.subr.bf16.mxu0 %v1060_v47  ;;  %v623_v56 = vcombine.low %v619_v54, %v620_v55  ;;  %v634_v57 = vpack.c.bf16 %v620_v55, %v620_v55  ;;  %v633_v63 = vpack.c.bf16 %v619_v54, %v619_v54  ;;  %v937_v1 = vld [vmem:[%s1369_s3] ss:$0 sm:$0xff] }
 0x153   : > { %936 = vst.sshfl [vmem:[#allocation6] sm:$0x33 pattern:$0x76325410] %v623_v56  ;;  %802 = vmatprep.mubr.bf16.mxu0 %v634_v57 }
 0x154   : > { %967 = vmatpush3.bf16.msra.mxu0 %v1061_v48 }
 0x155   : > { %968 = vmatprep.subr.bf16.mxu0 %v1062_v49 }
 0x158   : > { %969 = vmatpush3.bf16.msra.mxu0 %v1063_v50 }
 0x159   : > { %970 = vmatprep.subr.bf16.mxu0 %v1064_v51 }
 0x15c   : > { %971 = vmatpush3.bf16.msra.mxu0 %v1065_v52 }
 0x15d   : > { %972 = vmatprep.subr.bf16.mxu0 %v1066_v53 }
 0x160   : > { %973 = vmatpush3.bf16.msra.mxu0 %v1067_v58 }
 0x161   : > { %974 = vmatprep.subr.bf16.mxu0 %v1068_v59 }
 0x164   : > { %975 = vmatpush3.bf16.msra.mxu0 %v1069_v60 }
 0x165   : > { %976 = vmatprep.subr.bf16.mxu0 %v1070_v61 }
 0x168   : > { %977 = vmatpush3.bf16.msra.mxu0 %v1071_v62 }
 0x16b   : > { %803 = vmatmul.mubr.bf16.vlgmr.msra.gmra.mxu0 %v633_v63 }
 0x22b   : > { %v978_v0 = vpop.f32.mrf.mxu0 }
 0x22d   : > { %v979_v2 = vpop.f32.mrf.mxu0 }
 0x22e   : > { %v980_v3 = vadd.f32 %v979_v2, %v978_v0 }
 0x22f   : > { %v981_v4 = vpop.f32.mrf.mxu0 }
 0x230   : > { %v805_v5 = vadd.f32 %v980_v3, %v937_v1 }
 0x231   : > { %v982_v6 = vpop.f32.mrf.mxu0 }
 0x232   : > { %811 = vst.msk [vmem:[#allocation8] sm:$0x3] %vm810_vm0, %v805_v5 }
 0x233 PF: > { %p992_p6 = scmp.eq.s32.totalorder %s1178_s19, 5  ;;  %s1140_s8 = smov [#allocation6]  }
 0x234   : > { %s819_s9 = sshll.u32 %s1140_s8, 4  ;;  %s1141_s10 = smov [#allocation8]   ;;  %s820_s9 = int_to_ptr.vmem [resolvable:$true] %s819_s9 }
 0x235   : > { %s830_s11 = sshll.u32 %s1141_s10, 4  ;;  %s1072_s12 = scalar_lea.vmem %s820_s9, 64  ;;  %s831_s11 = int_to_ptr.vmem [resolvable:$true] %s830_s11 }
 0x236   : > { %p1073_p7 = scmp.ne.s32.totalorder %s820_s9, %s1072_s12  ;;  %p1079_p10 = scmp.lt.s32.totalorder %s820_s9, %s820_s9 }
 0x237   : > { %p1080_p11 = scmp.lt.s32.totalorder %s1072_s12, %s1072_s12 }
 0x238   : > { %p1074_p8 = pnand %p1073_p7, %p992_p6 }
 0x239   : > { %p1081_p12 = por %p1080_p11, %p1079_p10 }
 0x23a   : > { %p1075_p9 = pneg %p1074_p8 }
 0x23c   : > { %p1082_p13 = pnand %p1081_p12, %p1075_p9 }
 0x23e   : > { %1085 = shalt.err (!%p1082_p13)
}
 0x23f   : > { %985 = dma.vmem_to_hbm [thread:$0]  (%p992_p6), %s820_s9, 64, %s1370_s4, [#allocation7]  }
 0x240   : > { %s1096_s15 = scalar_lea.vmem %s831_s11, 32  ;;  %p1103_p3 = scmp.lt.s32.totalorder %s831_s11, %s831_s11 }
 0x241   : > { %p1097_p0 = scmp.ne.s32.totalorder %s831_s11, %s1096_s15  ;;  %p1104_p4 = scmp.lt.s32.totalorder %s1096_s15, %s1096_s15 }
 0x243   : > { %p1098_p1 = pnand %p1097_p0, %p992_p6  ;;  %p1105_p5 = por %p1104_p4, %p1103_p3 }
 0x245   : > { %p1099_p2 = pneg %p1098_p1 }
 0x247   : > { %p1106_p7 = pnand %p1105_p5, %p1099_p2 }
 0x249   : > { %1109 = shalt.err (!%p1106_p7)
}
 0x24a   : > { %987 = dma.vmem_to_hbm [thread:$0]  (%p992_p6), %s831_s11, 32, %s1371_s5, [#allocation9]  }
 0x24b   : > { %1127 = dma.done.wait (%p992_p6), [#allocation7], 64  }
 0x24c   : > { %1129 = vsyncadd (%p992_p6), [#allocation7], 4294967232 }
 0x24d   : > { %1131 = dma.done.wait (%p992_p6), [#allocation9], 32  }
 0x24e   : > { %1133 = vsyncadd (%p992_p6), [#allocation9], 4294967264 }
 0x24f PF: > { %s18_s18 = sadd.s32 1, %s1136_s18  }
 0x250   : > { %p15_p8 = scmp.ge.s32.totalorder %s18_s18, 8  }
 0x252   :  { %17 = sbr.rel (!%p15_p8) target bundleno = 2 (0x2), region = 117 }
 0x257   :  { %847 = vsyncpa [#allocation7], 1 }
 0x258   :  { %849 = vsyncpa [#allocation7 + $0x1], 1 }
 0x259   :  { %850 = vsyncpa [#allocation9], 1 }
 0x25a   :  { %851 = vsyncmov [#allocation5] }
 0x25d   :  { %s852_s20 = vpop.sfrf %851 }
 0x25e   :  { %p960_p9 = scmp.ne.s32.totalorder %s852_s20, 0 }
 0x260   :  { %856 = shalt.err (%p960_p9)  }

</bundles_post_ra>
